<compile_context>
chip_gen: v5e
topology: v5e:2x2
jax: 0.10.0
libtpu: 0.0.40
codegen_flags: <defaults>
</compile_context>

<pallas_src>
import jax
import jax.numpy as jnp
from jax import lax
from jax.experimental import pallas as pl
from jax.experimental.pallas import tpu as pltpu


def _gru_scan_kernel(gxr_ref, gxz_ref, gxn_ref, w_hh_ref, b_hn_ref,
                     o_ref, h_ref):
    """Sequential GRU recurrence over one time-block.

    gx*_ref : (Tb, B, C) precomputed input-side gate pre-activations
              (input bias folded in; hidden bias folded in for r/z)
    w_hh_ref: (3, C, C)  hidden->hidden weights per gate (r|z|n), laid out for h @ W
    b_hn_ref: (1, C)     hidden bias of the 'new' gate (must stay inside r * (...))
    o_ref   : (Tb, B, C) hidden-state outputs for this time-block
    h_ref   : (B, C)     persistent hidden state carried across time-blocks
    """
    blk = pl.program_id(0)

    @pl.when(blk == 0)
    def _():
        h_ref[...] = jnp.zeros_like(h_ref)

    Tb = gxr_ref.shape[0]
    B, C = h_ref.shape

    # Load weights/bias once per block; they stay resident as values for the
    # whole in-kernel time loop (no per-step weight traffic).
    w_hr = w_hh_ref[0]
    w_hz = w_hh_ref[1]
    w_hn = w_hh_ref[2]
    b_hn = jnp.broadcast_to(b_hn_ref[...], (B, C))  # broadcast hoisted out of loop

    def step(tau, h):
        # Only the h-dependent half of the gate math remains on the serial path.
        ghr = jnp.dot(h, w_hr, preferred_element_type=jnp.float32)
        ghz = jnp.dot(h, w_hz, preferred_element_type=jnp.float32)
        ghn = jnp.dot(h, w_hn, preferred_element_type=jnp.float32) + b_hn
        r = jax.nn.sigmoid(gxr_ref[tau] + ghr)
        z = jax.nn.sigmoid(gxz_ref[tau] + ghz)
        n = jnp.tanh(gxn_ref[tau] + r * ghn)
        h_new = (1.0 - z) * n + z * h
        o_ref[tau] = h_new.astype(o_ref.dtype)
        return h_new

    # Unrolled so the LLO scheduler can overlap the next step's MXU pushes with
    # the current step's EUP (sigmoid/tanh) and VPU work.
    h_ref[...] = lax.fori_loop(0, Tb, step, h_ref[...], unroll=min(Tb, 8))


def gru_pallas(x_btc, w_ih, w_hh, b_ih, b_hh, *, time_block=None):
    """GRU over (B, T, C) input.  Returns the hidden sequence time-major (T, B, C).

    w_ih, w_hh: (3, C, C) per-gate (r|z|n), pre-transposed so activations do x @ W.
    b_ih, b_hh: (3, C)
    """
    B, T, C = x_btc.shape

    # ---- Phase 1: hoisted, fully parallel input projection (one big matmul) ----
    proj = jnp.einsum('btc,gcd->gtbd', x_btc, w_ih)            # (3, T, B, C)
    gxr = proj[0] + (b_ih[0] + b_hh[0])                        # r: both biases folded
    gxz = proj[1] + (b_ih[1] + b_hh[1])                        # z: both biases folded
    gxn = proj[2] + b_ih[2]                                    # n: only input bias
    b_hn = b_hh[2].reshape(1, C)

    # ---- Phase 2: serial recurrence, blocked over time ----
    tb = T if time_block is None else time_block
    assert T % tb == 0, "time_block must divide T"
    grid = (T // tb,)

    out_tbc = pl.pallas_call(
        _gru_scan_kernel,
        out_shape=jax.ShapeDtypeStruct((T, B, C), jnp.float32),
        grid_spec=pltpu.PrefetchScalarGridSpec(
            num_scalar_prefetch=0,
            grid=grid,
            in_specs=[
                pl.BlockSpec((tb, B, C), lambda i: (i, 0, 0)),   # gxr
                pl.BlockSpec((tb, B, C), lambda i: (i, 0, 0)),   # gxz
                pl.BlockSpec((tb, B, C), lambda i: (i, 0, 0)),   # gxn
                pl.BlockSpec((3, C, C), lambda i: (0, 0, 0)),    # w_hh (resident)
                pl.BlockSpec((1, C), lambda i: (0, 0)),          # b_hn
            ],
            out_specs=pl.BlockSpec((tb, B, C), lambda i: (i, 0, 0)),
            scratch_shapes=[pltpu.VMEM((B, C), jnp.float32)],     # hidden state
        ),
        compiler_params=pltpu.CompilerParams(
            dimension_semantics=("arbitrary",)),  # time is a serial recurrence
    )(gxr, gxz, gxn, w_hh, b_hn)
    return out_tbc


class ASDModelPallas:
    """JAX/Pallas port of ASD_Model: GRU backend + reshape(-1, channels)."""

    def __init__(self, channels, key):
        self.channels = channels
        C = channels
        k = 1.0 / jnp.sqrt(jnp.float32(C))
        k1, k2, k3, k4 = jax.random.split(key, 4)
        # Per-gate layout (r|z|n), pre-transposed so activations do x @ W.
        self.w_ih = jax.random.uniform(k1, (3, C, C), jnp.float32, -k, k)
        self.w_hh = jax.random.uniform(k2, (3, C, C), jnp.float32, -k, k)
        self.b_ih = jax.random.uniform(k3, (3, C), jnp.float32, -k, k)
        self.b_hh = jax.random.uniform(k4, (3, C), jnp.float32, -k, k)

    def forward_audio_visual_backend(self, x_btc):
        out_tbc = gru_pallas(x_btc, self.w_ih, self.w_hh, self.b_ih, self.b_hh)
        # Kernel emits time-major; restore torch batch_first row order (b, t)
        # before the flattening reshape (cheap layout op outside the serial path).
        out_btc = jnp.transpose(out_tbc, (1, 0, 2))
        return jnp.reshape(out_btc, (-1, self.channels))        # (B*T, C)

    def __call__(self, feature):
        return self.forward_audio_visual_backend(feature)


def _gru_reference(x_btc, w_ih, w_hh, b_ih, b_hh):
    """Pure-JAX GRU reference (torch.nn.GRU semantics) for correctness check."""
    B, T, C = x_btc.shape
    h0 = jnp.zeros((B, C), jnp.float32)

    def step(h, x_t):
        r = jax.nn.sigmoid(x_t @ w_ih[0] + b_ih[0] + h @ w_hh[0] + b_hh[0])
        z = jax.nn.sigmoid(x_t @ w_ih[1] + b_ih[1] + h @ w_hh[1] + b_hh[1])
        n = jnp.tanh(x_t @ w_ih[2] + b_ih[2] + r * (h @ w_hh[2] + b_hh[2]))
        h_new = (1.0 - z) * n + z * h
        return h_new, h_new

    _, ys = lax.scan(step, h0, jnp.transpose(x_btc, (1, 0, 2)))
    return jnp.reshape(jnp.transpose(ys, (1, 0, 2)), (-1, C))


if __name__ == "__main__":
    B, T, C = 2, 8, 32
    key = jax.random.PRNGKey(0)
    k_param, k_x = jax.random.split(key)

    model = ASDModelPallas(channels=C, key=k_param)
    feature = jax.random.normal(k_x, (B, T, C), jnp.float32)

    out = jax.block_until_ready(model(feature))
    assert out.shape == (B * T, C), out.shape

    ref = _gru_reference(feature, model.w_ih, model.w_hh, model.b_ih, model.b_hh)
    assert jnp.allclose(out, ref, atol=2e-5, rtol=2e-5), "mismatch vs reference"

    print("KERNEL_OK")
</pallas_src>

<mosaic_0001>
module attributes {stable_mosaic.version = 11 : i64} {
  func.func @_gru_scan_kernel(%arg0: i32, %arg1: memref<8x2x32xf32, #tpu.memory_space<vmem>>, %arg2: memref<8x2x32xf32, #tpu.memory_space<vmem>>, %arg3: memref<8x2x32xf32, #tpu.memory_space<vmem>>, %arg4: memref<3x32x32xf32, #tpu.memory_space<vmem>>, %arg5: memref<1x32xf32, #tpu.memory_space<vmem>>, %arg6: memref<8x2x32xf32, #tpu.memory_space<vmem>>, %arg7: memref<2x32xf32, #tpu.memory_space<vmem>>) attributes {dimension_semantics = [#tpu.dimension_semantics<arbitrary>], iteration_bounds = array<i64: 1>, scalar_prefetch = 0 : i64, scratch_operands = 1 : i64, tpu.core_type = #tpu.core_type<tc>, window_params = [{transform_indices = @transform_0, window_bounds = array<i64: 8, 2, 32>}, {transform_indices = @transform_1, window_bounds = array<i64: 8, 2, 32>}, {transform_indices = @transform_2, window_bounds = array<i64: 8, 2, 32>}, {pipeline_mode = #tpu.pipeline_mode<synchronous>, transform_indices = @transform_3, window_bounds = array<i64: 3, 32, 32>}, {pipeline_mode = #tpu.pipeline_mode<synchronous>, transform_indices = @transform_4, window_bounds = array<i64: 1, 32>}, {transform_indices = @transform_5, window_bounds = array<i64: 8, 2, 32>}]} {
    %c0_i32 = arith.constant 0 : i32
    %0 = arith.cmpi eq, %arg0, %c0_i32 : i32
    %1 = arith.extui %0 : i1 to i32
    %c0_i32_0 = arith.constant 0 : i32
    %2 = arith.cmpi ne, %1, %c0_i32_0 : i32
    scf.if %2 {
      %cst_125 = arith.constant 0.000000e+00 : f32
      %310 = vector.broadcast %cst_125 : f32 to vector<2x32xf32>
      %c0_126 = arith.constant 0 : index
      %c0_127 = arith.constant 0 : index
      %311 = vector.load %arg7[%c0_126, %c0_127] : memref<2x32xf32, #tpu.memory_space<vmem>>, vector<2x32xf32>
      tpu.vector_store %arg7[%c0_126, %c0_127], %310 {strides = array<i32>} : memref<2x32xf32, #tpu.memory_space<vmem>>, vector<2x32xf32>,
    } else {
    }
    %c0 = arith.constant 0 : index
    %c0_1 = arith.constant 0 : index
    %c0_2 = arith.constant 0 : index
    %3 = vector.load %arg4[%c0, %c0_1, %c0_2] : memref<3x32x32xf32, #tpu.memory_space<vmem>>, vector<1x32x32xf32>
    %4 = vector.shape_cast %3 : vector<1x32x32xf32> to vector<32x32xf32>
    %c1 = arith.constant 1 : index
    %c0_3 = arith.constant 0 : index
    %c0_4 = arith.constant 0 : index
    %5 = vector.load %arg4[%c1, %c0_3, %c0_4] : memref<3x32x32xf32, #tpu.memory_space<vmem>>, vector<1x32x32xf32>
    %6 = vector.shape_cast %5 : vector<1x32x32xf32> to vector<32x32xf32>
    %c2 = arith.constant 2 : index
    %c0_5 = arith.constant 0 : index
    %c0_6 = arith.constant 0 : index
    %7 = vector.load %arg4[%c2, %c0_5, %c0_6] : memref<3x32x32xf32, #tpu.memory_space<vmem>>, vector<1x32x32xf32>
    %8 = vector.shape_cast %7 : vector<1x32x32xf32> to vector<32x32xf32>
    %c0_7 = arith.constant 0 : index
    %c0_8 = arith.constant 0 : index
    %9 = vector.load %arg5[%c0_7, %c0_8] : memref<1x32xf32, #tpu.memory_space<vmem>>, vector<1x32xf32>
    %10 = vector.shape_cast %9 : vector<1x32xf32> to vector<1x32xf32>
    %11 = vector.broadcast %10 : vector<1x32xf32> to vector<2x32xf32>
    %c0_9 = arith.constant 0 : index
    %c0_10 = arith.constant 0 : index
    %12 = vector.load %arg7[%c0_9, %c0_10] : memref<2x32xf32, #tpu.memory_space<vmem>>, vector<2x32xf32>
    %c0_i32_11 = arith.constant 0 : i32
    %cst = arith.constant dense<0.000000e+00> : vector<2x32xf32>
    %13 = tpu.matmul %12, %4, %cst {dimension_numbers = #tpu.dot_dimension_numbers<[1], [0], [0], [1], [0, 0, 1, 1], [], []>} : vector<2x32xf32>, vector<32x32xf32>, vector<2x32xf32> -> vector<2x32xf32>
    %cst_12 = arith.constant dense<0.000000e+00> : vector<2x32xf32>
    %14 = tpu.matmul %12, %6, %cst_12 {dimension_numbers = #tpu.dot_dimension_numbers<[1], [0], [0], [1], [0, 0, 1, 1], [], []>} : vector<2x32xf32>, vector<32x32xf32>, vector<2x32xf32> -> vector<2x32xf32>
    %cst_13 = arith.constant dense<0.000000e+00> : vector<2x32xf32>
    %15 = tpu.matmul %12, %8, %cst_13 {dimension_numbers = #tpu.dot_dimension_numbers<[1], [0], [0], [1], [0, 0, 1, 1], [], []>} : vector<2x32xf32>, vector<32x32xf32>, vector<2x32xf32> -> vector<2x32xf32>
    %16 = arith.addf %15, %11 : vector<2x32xf32>
    %17 = arith.index_cast %c0_i32_11 : i32 to index
    %c0_14 = arith.constant 0 : index
    %c0_15 = arith.constant 0 : index
    %18 = vector.load %arg1[%17, %c0_14, %c0_15] : memref<8x2x32xf32, #tpu.memory_space<vmem>>, vector<1x2x32xf32>
    %19 = vector.shape_cast %18 : vector<1x2x32xf32> to vector<2x32xf32>
    %20 = arith.addf %19, %13 : vector<2x32xf32>
    %21 = arith.negf %20 : vector<2x32xf32>
    %22 = math.exp %21 : vector<2x32xf32>
    %cst_16 = arith.constant 1.000000e+00 : f32
    %23 = vector.broadcast %cst_16 : f32 to vector<2x32xf32>
    %24 = arith.addf %23, %22 : vector<2x32xf32>
    %25 = arith.divf %23, %24 : vector<2x32xf32>
    %26 = arith.index_cast %c0_i32_11 : i32 to index
    %c0_17 = arith.constant 0 : index
    %c0_18 = arith.constant 0 : index
    %27 = vector.load %arg2[%26, %c0_17, %c0_18] : memref<8x2x32xf32, #tpu.memory_space<vmem>>, vector<1x2x32xf32>
    %28 = vector.shape_cast %27 : vector<1x2x32xf32> to vector<2x32xf32>
    %29 = arith.addf %28, %14 : vector<2x32xf32>
    %30 = arith.negf %29 : vector<2x32xf32>
    %31 = math.exp %30 : vector<2x32xf32>
    %cst_19 = arith.constant 1.000000e+00 : f32
    %32 = vector.broadcast %cst_19 : f32 to vector<2x32xf32>
    %33 = arith.addf %32, %31 : vector<2x32xf32>
    %34 = arith.divf %32, %33 : vector<2x32xf32>
    %35 = arith.index_cast %c0_i32_11 : i32 to index
    %c0_20 = arith.constant 0 : index
    %c0_21 = arith.constant 0 : index
    %36 = vector.load %arg3[%35, %c0_20, %c0_21] : memref<8x2x32xf32, #tpu.memory_space<vmem>>, vector<1x2x32xf32>
    %37 = vector.shape_cast %36 : vector<1x2x32xf32> to vector<2x32xf32>
    %38 = arith.mulf %25, %16 : vector<2x32xf32>
    %39 = arith.addf %37, %38 : vector<2x32xf32>
    %40 = math.tanh %39 : vector<2x32xf32>
    %cst_22 = arith.constant 1.000000e+00 : f32
    %41 = vector.broadcast %cst_22 : f32 to vector<2x32xf32>
    %42 = arith.subf %41, %34 : vector<2x32xf32>
    %43 = arith.mulf %42, %40 : vector<2x32xf32>
    %44 = arith.mulf %34, %12 : vector<2x32xf32>
    %45 = arith.addf %43, %44 : vector<2x32xf32>
    %46 = arith.index_cast %c0_i32_11 : i32 to index
    %c0_23 = arith.constant 0 : index
    %c0_24 = arith.constant 0 : index
    %47 = vector.load %arg6[%46, %c0_23, %c0_24] : memref<8x2x32xf32, #tpu.memory_space<vmem>>, vector<1x2x32xf32>
    %48 = vector.shape_cast %47 : vector<1x2x32xf32> to vector<2x32xf32>
    %49 = vector.shape_cast %45 : vector<2x32xf32> to vector<1x2x32xf32>
    tpu.vector_store %arg6[%46, %c0_23, %c0_24], %49 {strides = array<i32>} : memref<8x2x32xf32, #tpu.memory_space<vmem>>, vector<1x2x32xf32>,
    %c1_i32 = arith.constant 1 : i32
    %cst_25 = arith.constant dense<0.000000e+00> : vector<2x32xf32>
    %50 = tpu.matmul %45, %4, %cst_25 {dimension_numbers = #tpu.dot_dimension_numbers<[1], [0], [0], [1], [0, 0, 1, 1], [], []>} : vector<2x32xf32>, vector<32x32xf32>, vector<2x32xf32> -> vector<2x32xf32>
    %cst_26 = arith.constant dense<0.000000e+00> : vector<2x32xf32>
    %51 = tpu.matmul %45, %6, %cst_26 {dimension_numbers = #tpu.dot_dimension_numbers<[1], [0], [0], [1], [0, 0, 1, 1], [], []>} : vector<2x32xf32>, vector<32x32xf32>, vector<2x32xf32> -> vector<2x32xf32>
    %cst_27 = arith.constant dense<0.000000e+00> : vector<2x32xf32>
    %52 = tpu.matmul %45, %8, %cst_27 {dimension_numbers = #tpu.dot_dimension_numbers<[1], [0], [0], [1], [0, 0, 1, 1], [], []>} : vector<2x32xf32>, vector<32x32xf32>, vector<2x32xf32> -> vector<2x32xf32>
    %53 = arith.addf %52, %11 : vector<2x32xf32>
    %54 = arith.index_cast %c1_i32 : i32 to index
    %c0_28 = arith.constant 0 : index
    %c0_29 = arith.constant 0 : index
    %55 = vector.load %arg1[%54, %c0_28, %c0_29] : memref<8x2x32xf32, #tpu.memory_space<vmem>>, vector<1x2x32xf32>
    %56 = vector.shape_cast %55 : vector<1x2x32xf32> to vector<2x32xf32>
    %57 = arith.addf %56, %50 : vector<2x32xf32>
    %58 = arith.negf %57 : vector<2x32xf32>
    %59 = math.exp %58 : vector<2x32xf32>
    %cst_30 = arith.constant 1.000000e+00 : f32
    %60 = vector.broadcast %cst_30 : f32 to vector<2x32xf32>
    %61 = arith.addf %60, %59 : vector<2x32xf32>
    %62 = arith.divf %60, %61 : vector<2x32xf32>
    %63 = arith.index_cast %c1_i32 : i32 to index
    %c0_31 = arith.constant 0 : index
    %c0_32 = arith.constant 0 : index
    %64 = vector.load %arg2[%63, %c0_31, %c0_32] : memref<8x2x32xf32, #tpu.memory_space<vmem>>, vector<1x2x32xf32>
    %65 = vector.shape_cast %64 : vector<1x2x32xf32> to vector<2x32xf32>
    %66 = arith.addf %65, %51 : vector<2x32xf32>
    %67 = arith.negf %66 : vector<2x32xf32>
    %68 = math.exp %67 : vector<2x32xf32>
    %cst_33 = arith.constant 1.000000e+00 : f32
    %69 = vector.broadcast %cst_33 : f32 to vector<2x32xf32>
    %70 = arith.addf %69, %68 : vector<2x32xf32>
    %71 = arith.divf %69, %70 : vector<2x32xf32>
    %72 = arith.index_cast %c1_i32 : i32 to index
    %c0_34 = arith.constant 0 : index
    %c0_35 = arith.constant 0 : index
    %73 = vector.load %arg3[%72, %c0_34, %c0_35] : memref<8x2x32xf32, #tpu.memory_space<vmem>>, vector<1x2x32xf32>
    %74 = vector.shape_cast %73 : vector<1x2x32xf32> to vector<2x32xf32>
    %75 = arith.mulf %62, %53 : vector<2x32xf32>
    %76 = arith.addf %74, %75 : vector<2x32xf32>
    %77 = math.tanh %76 : vector<2x32xf32>
    %cst_36 = arith.constant 1.000000e+00 : f32
    %78 = vector.broadcast %cst_36 : f32 to vector<2x32xf32>
    %79 = arith.subf %78, %71 : vector<2x32xf32>
    %80 = arith.mulf %79, %77 : vector<2x32xf32>
    %81 = arith.mulf %71, %45 : vector<2x32xf32>
    %82 = arith.addf %80, %81 : vector<2x32xf32>
    %83 = arith.index_cast %c1_i32 : i32 to index
    %c0_37 = arith.constant 0 : index
    %c0_38 = arith.constant 0 : index
    %84 = vector.load %arg6[%83, %c0_37, %c0_38] : memref<8x2x32xf32, #tpu.memory_space<vmem>>, vector<1x2x32xf32>
    %85 = vector.shape_cast %84 : vector<1x2x32xf32> to vector<2x32xf32>
    %86 = vector.shape_cast %82 : vector<2x32xf32> to vector<1x2x32xf32>
    tpu.vector_store %arg6[%83, %c0_37, %c0_38], %86 {strides = array<i32>} : memref<8x2x32xf32, #tpu.memory_space<vmem>>, vector<1x2x32xf32>,
    %c2_i32 = arith.constant 2 : i32
    %cst_39 = arith.constant dense<0.000000e+00> : vector<2x32xf32>
    %87 = tpu.matmul %82, %4, %cst_39 {dimension_numbers = #tpu.dot_dimension_numbers<[1], [0], [0], [1], [0, 0, 1, 1], [], []>} : vector<2x32xf32>, vector<32x32xf32>, vector<2x32xf32> -> vector<2x32xf32>
    %cst_40 = arith.constant dense<0.000000e+00> : vector<2x32xf32>
    %88 = tpu.matmul %82, %6, %cst_40 {dimension_numbers = #tpu.dot_dimension_numbers<[1], [0], [0], [1], [0, 0, 1, 1], [], []>} : vector<2x32xf32>, vector<32x32xf32>, vector<2x32xf32> -> vector<2x32xf32>
    %cst_41 = arith.constant dense<0.000000e+00> : vector<2x32xf32>
    %89 = tpu.matmul %82, %8, %cst_41 {dimension_numbers = #tpu.dot_dimension_numbers<[1], [0], [0], [1], [0, 0, 1, 1], [], []>} : vector<2x32xf32>, vector<32x32xf32>, vector<2x32xf32> -> vector<2x32xf32>
    %90 = arith.addf %89, %11 : vector<2x32xf32>
    %91 = arith.index_cast %c2_i32 : i32 to index
    %c0_42 = arith.constant 0 : index
    %c0_43 = arith.constant 0 : index
    %92 = vector.load %arg1[%91, %c0_42, %c0_43] : memref<8x2x32xf32, #tpu.memory_space<vmem>>, vector<1x2x32xf32>
    %93 = vector.shape_cast %92 : vector<1x2x32xf32> to vector<2x32xf32>
    %94 = arith.addf %93, %87 : vector<2x32xf32>
    %95 = arith.negf %94 : vector<2x32xf32>
    %96 = math.exp %95 : vector<2x32xf32>
    %cst_44 = arith.constant 1.000000e+00 : f32
    %97 = vector.broadcast %cst_44 : f32 to vector<2x32xf32>
    %98 = arith.addf %97, %96 : vector<2x32xf32>
    %99 = arith.divf %97, %98 : vector<2x32xf32>
    %100 = arith.index_cast %c2_i32 : i32 to index
    %c0_45 = arith.constant 0 : index
    %c0_46 = arith.constant 0 : index
    %101 = vector.load %arg2[%100, %c0_45, %c0_46] : memref<8x2x32xf32, #tpu.memory_space<vmem>>, vector<1x2x32xf32>
    %102 = vector.shape_cast %101 : vector<1x2x32xf32> to vector<2x32xf32>
    %103 = arith.addf %102, %88 : vector<2x32xf32>
    %104 = arith.negf %103 : vector<2x32xf32>
    %105 = math.exp %104 : vector<2x32xf32>
    %cst_47 = arith.constant 1.000000e+00 : f32
    %106 = vector.broadcast %cst_47 : f32 to vector<2x32xf32>
    %107 = arith.addf %106, %105 : vector<2x32xf32>
    %108 = arith.divf %106, %107 : vector<2x32xf32>
    %109 = arith.index_cast %c2_i32 : i32 to index
    %c0_48 = arith.constant 0 : index
    %c0_49 = arith.constant 0 : index
    %110 = vector.load %arg3[%109, %c0_48, %c0_49] : memref<8x2x32xf32, #tpu.memory_space<vmem>>, vector<1x2x32xf32>
    %111 = vector.shape_cast %110 : vector<1x2x32xf32> to vector<2x32xf32>
    %112 = arith.mulf %99, %90 : vector<2x32xf32>
    %113 = arith.addf %111, %112 : vector<2x32xf32>
    %114 = math.tanh %113 : vector<2x32xf32>
    %cst_50 = arith.constant 1.000000e+00 : f32
    %115 = vector.broadcast %cst_50 : f32 to vector<2x32xf32>
    %116 = arith.subf %115, %108 : vector<2x32xf32>
    %117 = arith.mulf %116, %114 : vector<2x32xf32>
    %118 = arith.mulf %108, %82 : vector<2x32xf32>
    %119 = arith.addf %117, %118 : vector<2x32xf32>
    %120 = arith.index_cast %c2_i32 : i32 to index
    %c0_51 = arith.constant 0 : index
    %c0_52 = arith.constant 0 : index
    %121 = vector.load %arg6[%120, %c0_51, %c0_52] : memref<8x2x32xf32, #tpu.memory_space<vmem>>, vector<1x2x32xf32>
    %122 = vector.shape_cast %121 : vector<1x2x32xf32> to vector<2x32xf32>
    %123 = vector.shape_cast %119 : vector<2x32xf32> to vector<1x2x32xf32>
    tpu.vector_store %arg6[%120, %c0_51, %c0_52], %123 {strides = array<i32>} : memref<8x2x32xf32, #tpu.memory_space<vmem>>, vector<1x2x32xf32>,
    %c3_i32 = arith.constant 3 : i32
    %cst_53 = arith.constant dense<0.000000e+00> : vector<2x32xf32>
    %124 = tpu.matmul %119, %4, %cst_53 {dimension_numbers = #tpu.dot_dimension_numbers<[1], [0], [0], [1], [0, 0, 1, 1], [], []>} : vector<2x32xf32>, vector<32x32xf32>, vector<2x32xf32> -> vector<2x32xf32>
    %cst_54 = arith.constant dense<0.000000e+00> : vector<2x32xf32>
    %125 = tpu.matmul %119, %6, %cst_54 {dimension_numbers = #tpu.dot_dimension_numbers<[1], [0], [0], [1], [0, 0, 1, 1], [], []>} : vector<2x32xf32>, vector<32x32xf32>, vector<2x32xf32> -> vector<2x32xf32>
    %cst_55 = arith.constant dense<0.000000e+00> : vector<2x32xf32>
    %126 = tpu.matmul %119, %8, %cst_55 {dimension_numbers = #tpu.dot_dimension_numbers<[1], [0], [0], [1], [0, 0, 1, 1], [], []>} : vector<2x32xf32>, vector<32x32xf32>, vector<2x32xf32> -> vector<2x32xf32>
    %127 = arith.addf %126, %11 : vector<2x32xf32>
    %128 = arith.index_cast %c3_i32 : i32 to index
    %c0_56 = arith.constant 0 : index
    %c0_57 = arith.constant 0 : index
    %129 = vector.load %arg1[%128, %c0_56, %c0_57] : memref<8x2x32xf32, #tpu.memory_space<vmem>>, vector<1x2x32xf32>
    %130 = vector.shape_cast %129 : vector<1x2x32xf32> to vector<2x32xf32>
    %131 = arith.addf %130, %124 : vector<2x32xf32>
    %132 = arith.negf %131 : vector<2x32xf32>
    %133 = math.exp %132 : vector<2x32xf32>
    %cst_58 = arith.constant 1.000000e+00 : f32
    %134 = vector.broadcast %cst_58 : f32 to vector<2x32xf32>
    %135 = arith.addf %134, %133 : vector<2x32xf32>
    %136 = arith.divf %134, %135 : vector<2x32xf32>
    %137 = arith.index_cast %c3_i32 : i32 to index
    %c0_59 = arith.constant 0 : index
    %c0_60 = arith.constant 0 : index
    %138 = vector.load %arg2[%137, %c0_59, %c0_60] : memref<8x2x32xf32, #tpu.memory_space<vmem>>, vector<1x2x32xf32>
    %139 = vector.shape_cast %138 : vector<1x2x32xf32> to vector<2x32xf32>
    %140 = arith.addf %139, %125 : vector<2x32xf32>
    %141 = arith.negf %140 : vector<2x32xf32>
    %142 = math.exp %141 : vector<2x32xf32>
    %cst_61 = arith.constant 1.000000e+00 : f32
    %143 = vector.broadcast %cst_61 : f32 to vector<2x32xf32>
    %144 = arith.addf %143, %142 : vector<2x32xf32>
    %145 = arith.divf %143, %144 : vector<2x32xf32>
    %146 = arith.index_cast %c3_i32 : i32 to index
    %c0_62 = arith.constant 0 : index
    %c0_63 = arith.constant 0 : index
    %147 = vector.load %arg3[%146, %c0_62, %c0_63] : memref<8x2x32xf32, #tpu.memory_space<vmem>>, vector<1x2x32xf32>
    %148 = vector.shape_cast %147 : vector<1x2x32xf32> to vector<2x32xf32>
    %149 = arith.mulf %136, %127 : vector<2x32xf32>
    %150 = arith.addf %148, %149 : vector<2x32xf32>
    %151 = math.tanh %150 : vector<2x32xf32>
    %cst_64 = arith.constant 1.000000e+00 : f32
    %152 = vector.broadcast %cst_64 : f32 to vector<2x32xf32>
    %153 = arith.subf %152, %145 : vector<2x32xf32>
    %154 = arith.mulf %153, %151 : vector<2x32xf32>
    %155 = arith.mulf %145, %119 : vector<2x32xf32>
    %156 = arith.addf %154, %155 : vector<2x32xf32>
    %157 = arith.index_cast %c3_i32 : i32 to index
    %c0_65 = arith.constant 0 : index
    %c0_66 = arith.constant 0 : index
    %158 = vector.load %arg6[%157, %c0_65, %c0_66] : memref<8x2x32xf32, #tpu.memory_space<vmem>>, vector<1x2x32xf32>
    %159 = vector.shape_cast %158 : vector<1x2x32xf32> to vector<2x32xf32>
    %160 = vector.shape_cast %156 : vector<2x32xf32> to vector<1x2x32xf32>
    tpu.vector_store %arg6[%157, %c0_65, %c0_66], %160 {strides = array<i32>} : memref<8x2x32xf32, #tpu.memory_space<vmem>>, vector<1x2x32xf32>,
    %c4_i32 = arith.constant 4 : i32
    %cst_67 = arith.constant dense<0.000000e+00> : vector<2x32xf32>
    %161 = tpu.matmul %156, %4, %cst_67 {dimension_numbers = #tpu.dot_dimension_numbers<[1], [0], [0], [1], [0, 0, 1, 1], [], []>} : vector<2x32xf32>, vector<32x32xf32>, vector<2x32xf32> -> vector<2x32xf32>
    %cst_68 = arith.constant dense<0.000000e+00> : vector<2x32xf32>
    %162 = tpu.matmul %156, %6, %cst_68 {dimension_numbers = #tpu.dot_dimension_numbers<[1], [0], [0], [1], [0, 0, 1, 1], [], []>} : vector<2x32xf32>, vector<32x32xf32>, vector<2x32xf32> -> vector<2x32xf32>
    %cst_69 = arith.constant dense<0.000000e+00> : vector<2x32xf32>
    %163 = tpu.matmul %156, %8, %cst_69 {dimension_numbers = #tpu.dot_dimension_numbers<[1], [0], [0], [1], [0, 0, 1, 1], [], []>} : vector<2x32xf32>, vector<32x32xf32>, vector<2x32xf32> -> vector<2x32xf32>
    %164 = arith.addf %163, %11 : vector<2x32xf32>
    %165 = arith.index_cast %c4_i32 : i32 to index
    %c0_70 = arith.constant 0 : index
    %c0_71 = arith.constant 0 : index
    %166 = vector.load %arg1[%165, %c0_70, %c0_71] : memref<8x2x32xf32, #tpu.memory_space<vmem>>, vector<1x2x32xf32>
    %167 = vector.shape_cast %166 : vector<1x2x32xf32> to vector<2x32xf32>
    %168 = arith.addf %167, %161 : vector<2x32xf32>
    %169 = arith.negf %168 : vector<2x32xf32>
    %170 = math.exp %169 : vector<2x32xf32>
    %cst_72 = arith.constant 1.000000e+00 : f32
    %171 = vector.broadcast %cst_72 : f32 to vector<2x32xf32>
    %172 = arith.addf %171, %170 : vector<2x32xf32>
    %173 = arith.divf %171, %172 : vector<2x32xf32>
    %174 = arith.index_cast %c4_i32 : i32 to index
    %c0_73 = arith.constant 0 : index
    %c0_74 = arith.constant 0 : index
    %175 = vector.load %arg2[%174, %c0_73, %c0_74] : memref<8x2x32xf32, #tpu.memory_space<vmem>>, vector<1x2x32xf32>
    %176 = vector.shape_cast %175 : vector<1x2x32xf32> to vector<2x32xf32>
    %177 = arith.addf %176, %162 : vector<2x32xf32>
    %178 = arith.negf %177 : vector<2x32xf32>
    %179 = math.exp %178 : vector<2x32xf32>
    %cst_75 = arith.constant 1.000000e+00 : f32
    %180 = vector.broadcast %cst_75 : f32 to vector<2x32xf32>
    %181 = arith.addf %180, %179 : vector<2x32xf32>
    %182 = arith.divf %180, %181 : vector<2x32xf32>
    %183 = arith.index_cast %c4_i32 : i32 to index
    %c0_76 = arith.constant 0 : index
    %c0_77 = arith.constant 0 : index
    %184 = vector.load %arg3[%183, %c0_76, %c0_77] : memref<8x2x32xf32, #tpu.memory_space<vmem>>, vector<1x2x32xf32>
    %185 = vector.shape_cast %184 : vector<1x2x32xf32> to vector<2x32xf32>
    %186 = arith.mulf %173, %164 : vector<2x32xf32>
    %187 = arith.addf %185, %186 : vector<2x32xf32>
    %188 = math.tanh %187 : vector<2x32xf32>
    %cst_78 = arith.constant 1.000000e+00 : f32
    %189 = vector.broadcast %cst_78 : f32 to vector<2x32xf32>
    %190 = arith.subf %189, %182 : vector<2x32xf32>
    %191 = arith.mulf %190, %188 : vector<2x32xf32>
    %192 = arith.mulf %182, %156 : vector<2x32xf32>
    %193 = arith.addf %191, %192 : vector<2x32xf32>
    %194 = arith.index_cast %c4_i32 : i32 to index
    %c0_79 = arith.constant 0 : index
    %c0_80 = arith.constant 0 : index
    %195 = vector.load %arg6[%194, %c0_79, %c0_80] : memref<8x2x32xf32, #tpu.memory_space<vmem>>, vector<1x2x32xf32>
    %196 = vector.shape_cast %195 : vector<1x2x32xf32> to vector<2x32xf32>
    %197 = vector.shape_cast %193 : vector<2x32xf32> to vector<1x2x32xf32>
    tpu.vector_store %arg6[%194, %c0_79, %c0_80], %197 {strides = array<i32>} : memref<8x2x32xf32, #tpu.memory_space<vmem>>, vector<1x2x32xf32>,
    %c5_i32 = arith.constant 5 : i32
    %cst_81 = arith.constant dense<0.000000e+00> : vector<2x32xf32>
    %198 = tpu.matmul %193, %4, %cst_81 {dimension_numbers = #tpu.dot_dimension_numbers<[1], [0], [0], [1], [0, 0, 1, 1], [], []>} : vector<2x32xf32>, vector<32x32xf32>, vector<2x32xf32> -> vector<2x32xf32>
    %cst_82 = arith.constant dense<0.000000e+00> : vector<2x32xf32>
    %199 = tpu.matmul %193, %6, %cst_82 {dimension_numbers = #tpu.dot_dimension_numbers<[1], [0], [0], [1], [0, 0, 1, 1], [], []>} : vector<2x32xf32>, vector<32x32xf32>, vector<2x32xf32> -> vector<2x32xf32>
    %cst_83 = arith.constant dense<0.000000e+00> : vector<2x32xf32>
    %200 = tpu.matmul %193, %8, %cst_83 {dimension_numbers = #tpu.dot_dimension_numbers<[1], [0], [0], [1], [0, 0, 1, 1], [], []>} : vector<2x32xf32>, vector<32x32xf32>, vector<2x32xf32> -> vector<2x32xf32>
    %201 = arith.addf %200, %11 : vector<2x32xf32>
    %202 = arith.index_cast %c5_i32 : i32 to index
    %c0_84 = arith.constant 0 : index
    %c0_85 = arith.constant 0 : index
    %203 = vector.load %arg1[%202, %c0_84, %c0_85] : memref<8x2x32xf32, #tpu.memory_space<vmem>>, vector<1x2x32xf32>
    %204 = vector.shape_cast %203 : vector<1x2x32xf32> to vector<2x32xf32>
    %205 = arith.addf %204, %198 : vector<2x32xf32>
    %206 = arith.negf %205 : vector<2x32xf32>
    %207 = math.exp %206 : vector<2x32xf32>
    %cst_86 = arith.constant 1.000000e+00 : f32
    %208 = vector.broadcast %cst_86 : f32 to vector<2x32xf32>
    %209 = arith.addf %208, %207 : vector<2x32xf32>
    %210 = arith.divf %208, %209 : vector<2x32xf32>
    %211 = arith.index_cast %c5_i32 : i32 to index
    %c0_87 = arith.constant 0 : index
    %c0_88 = arith.constant 0 : index
    %212 = vector.load %arg2[%211, %c0_87, %c0_88] : memref<8x2x32xf32, #tpu.memory_space<vmem>>, vector<1x2x32xf32>
    %213 = vector.shape_cast %212 : vector<1x2x32xf32> to vector<2x32xf32>
    %214 = arith.addf %213, %199 : vector<2x32xf32>
    %215 = arith.negf %214 : vector<2x32xf32>
    %216 = math.exp %215 : vector<2x32xf32>
    %cst_89 = arith.constant 1.000000e+00 : f32
    %217 = vector.broadcast %cst_89 : f32 to vector<2x32xf32>
    %218 = arith.addf %217, %216 : vector<2x32xf32>
    %219 = arith.divf %217, %218 : vector<2x32xf32>
    %220 = arith.index_cast %c5_i32 : i32 to index
    %c0_90 = arith.constant 0 : index
    %c0_91 = arith.constant 0 : index
    %221 = vector.load %arg3[%220, %c0_90, %c0_91] : memref<8x2x32xf32, #tpu.memory_space<vmem>>, vector<1x2x32xf32>
    %222 = vector.shape_cast %221 : vector<1x2x32xf32> to vector<2x32xf32>
    %223 = arith.mulf %210, %201 : vector<2x32xf32>
    %224 = arith.addf %222, %223 : vector<2x32xf32>
    %225 = math.tanh %224 : vector<2x32xf32>
    %cst_92 = arith.constant 1.000000e+00 : f32
    %226 = vector.broadcast %cst_92 : f32 to vector<2x32xf32>
    %227 = arith.subf %226, %219 : vector<2x32xf32>
    %228 = arith.mulf %227, %225 : vector<2x32xf32>
    %229 = arith.mulf %219, %193 : vector<2x32xf32>
    %230 = arith.addf %228, %229 : vector<2x32xf32>
    %231 = arith.index_cast %c5_i32 : i32 to index
    %c0_93 = arith.constant 0 : index
    %c0_94 = arith.constant 0 : index
    %232 = vector.load %arg6[%231, %c0_93, %c0_94] : memref<8x2x32xf32, #tpu.memory_space<vmem>>, vector<1x2x32xf32>
    %233 = vector.shape_cast %232 : vector<1x2x32xf32> to vector<2x32xf32>
    %234 = vector.shape_cast %230 : vector<2x32xf32> to vector<1x2x32xf32>
    tpu.vector_store %arg6[%231, %c0_93, %c0_94], %234 {strides = array<i32>} : memref<8x2x32xf32, #tpu.memory_space<vmem>>, vector<1x2x32xf32>,
    %c6_i32 = arith.constant 6 : i32
    %cst_95 = arith.constant dense<0.000000e+00> : vector<2x32xf32>
    %235 = tpu.matmul %230, %4, %cst_95 {dimension_numbers = #tpu.dot_dimension_numbers<[1], [0], [0], [1], [0, 0, 1, 1], [], []>} : vector<2x32xf32>, vector<32x32xf32>, vector<2x32xf32> -> vector<2x32xf32>
    %cst_96 = arith.constant dense<0.000000e+00> : vector<2x32xf32>
    %236 = tpu.matmul %230, %6, %cst_96 {dimension_numbers = #tpu.dot_dimension_numbers<[1], [0], [0], [1], [0, 0, 1, 1], [], []>} : vector<2x32xf32>, vector<32x32xf32>, vector<2x32xf32> -> vector<2x32xf32>
    %cst_97 = arith.constant dense<0.000000e+00> : vector<2x32xf32>
    %237 = tpu.matmul %230, %8, %cst_97 {dimension_numbers = #tpu.dot_dimension_numbers<[1], [0], [0], [1], [0, 0, 1, 1], [], []>} : vector<2x32xf32>, vector<32x32xf32>, vector<2x32xf32> -> vector<2x32xf32>
    %238 = arith.addf %237, %11 : vector<2x32xf32>
    %239 = arith.index_cast %c6_i32 : i32 to index
    %c0_98 = arith.constant 0 : index
    %c0_99 = arith.constant 0 : index
    %240 = vector.load %arg1[%239, %c0_98, %c0_99] : memref<8x2x32xf32, #tpu.memory_space<vmem>>, vector<1x2x32xf32>
    %241 = vector.shape_cast %240 : vector<1x2x32xf32> to vector<2x32xf32>
    %242 = arith.addf %241, %235 : vector<2x32xf32>
    %243 = arith.negf %242 : vector<2x32xf32>
    %244 = math.exp %243 : vector<2x32xf32>
    %cst_100 = arith.constant 1.000000e+00 : f32
    %245 = vector.broadcast %cst_100 : f32 to vector<2x32xf32>
    %246 = arith.addf %245, %244 : vector<2x32xf32>
    %247 = arith.divf %245, %246 : vector<2x32xf32>
    %248 = arith.index_cast %c6_i32 : i32 to index
    %c0_101 = arith.constant 0 : index
    %c0_102 = arith.constant 0 : index
    %249 = vector.load %arg2[%248, %c0_101, %c0_102] : memref<8x2x32xf32, #tpu.memory_space<vmem>>, vector<1x2x32xf32>
    %250 = vector.shape_cast %249 : vector<1x2x32xf32> to vector<2x32xf32>
    %251 = arith.addf %250, %236 : vector<2x32xf32>
    %252 = arith.negf %251 : vector<2x32xf32>
    %253 = math.exp %252 : vector<2x32xf32>
    %cst_103 = arith.constant 1.000000e+00 : f32
    %254 = vector.broadcast %cst_103 : f32 to vector<2x32xf32>
    %255 = arith.addf %254, %253 : vector<2x32xf32>
    %256 = arith.divf %254, %255 : vector<2x32xf32>
    %257 = arith.index_cast %c6_i32 : i32 to index
    %c0_104 = arith.constant 0 : index
    %c0_105 = arith.constant 0 : index
    %258 = vector.load %arg3[%257, %c0_104, %c0_105] : memref<8x2x32xf32, #tpu.memory_space<vmem>>, vector<1x2x32xf32>
    %259 = vector.shape_cast %258 : vector<1x2x32xf32> to vector<2x32xf32>
    %260 = arith.mulf %247, %238 : vector<2x32xf32>
    %261 = arith.addf %259, %260 : vector<2x32xf32>
    %262 = math.tanh %261 : vector<2x32xf32>
    %cst_106 = arith.constant 1.000000e+00 : f32
    %263 = vector.broadcast %cst_106 : f32 to vector<2x32xf32>
    %264 = arith.subf %263, %256 : vector<2x32xf32>
    %265 = arith.mulf %264, %262 : vector<2x32xf32>
    %266 = arith.mulf %256, %230 : vector<2x32xf32>
    %267 = arith.addf %265, %266 : vector<2x32xf32>
    %268 = arith.index_cast %c6_i32 : i32 to index
    %c0_107 = arith.constant 0 : index
    %c0_108 = arith.constant 0 : index
    %269 = vector.load %arg6[%268, %c0_107, %c0_108] : memref<8x2x32xf32, #tpu.memory_space<vmem>>, vector<1x2x32xf32>
    %270 = vector.shape_cast %269 : vector<1x2x32xf32> to vector<2x32xf32>
    %271 = vector.shape_cast %267 : vector<2x32xf32> to vector<1x2x32xf32>
    tpu.vector_store %arg6[%268, %c0_107, %c0_108], %271 {strides = array<i32>} : memref<8x2x32xf32, #tpu.memory_space<vmem>>, vector<1x2x32xf32>,
    %c7_i32 = arith.constant 7 : i32
    %cst_109 = arith.constant dense<0.000000e+00> : vector<2x32xf32>
    %272 = tpu.matmul %267, %4, %cst_109 {dimension_numbers = #tpu.dot_dimension_numbers<[1], [0], [0], [1], [0, 0, 1, 1], [], []>} : vector<2x32xf32>, vector<32x32xf32>, vector<2x32xf32> -> vector<2x32xf32>
    %cst_110 = arith.constant dense<0.000000e+00> : vector<2x32xf32>
    %273 = tpu.matmul %267, %6, %cst_110 {dimension_numbers = #tpu.dot_dimension_numbers<[1], [0], [0], [1], [0, 0, 1, 1], [], []>} : vector<2x32xf32>, vector<32x32xf32>, vector<2x32xf32> -> vector<2x32xf32>
    %cst_111 = arith.constant dense<0.000000e+00> : vector<2x32xf32>
    %274 = tpu.matmul %267, %8, %cst_111 {dimension_numbers = #tpu.dot_dimension_numbers<[1], [0], [0], [1], [0, 0, 1, 1], [], []>} : vector<2x32xf32>, vector<32x32xf32>, vector<2x32xf32> -> vector<2x32xf32>
    %275 = arith.addf %274, %11 : vector<2x32xf32>
    %276 = arith.index_cast %c7_i32 : i32 to index
    %c0_112 = arith.constant 0 : index
    %c0_113 = arith.constant 0 : index
    %277 = vector.load %arg1[%276, %c0_112, %c0_113] : memref<8x2x32xf32, #tpu.memory_space<vmem>>, vector<1x2x32xf32>
    %278 = vector.shape_cast %277 : vector<1x2x32xf32> to vector<2x32xf32>
    %279 = arith.addf %278, %272 : vector<2x32xf32>
    %280 = arith.negf %279 : vector<2x32xf32>
    %281 = math.exp %280 : vector<2x32xf32>
    %cst_114 = arith.constant 1.000000e+00 : f32
    %282 = vector.broadcast %cst_114 : f32 to vector<2x32xf32>
    %283 = arith.addf %282, %281 : vector<2x32xf32>
    %284 = arith.divf %282, %283 : vector<2x32xf32>
    %285 = arith.index_cast %c7_i32 : i32 to index
    %c0_115 = arith.constant 0 : index
    %c0_116 = arith.constant 0 : index
    %286 = vector.load %arg2[%285, %c0_115, %c0_116] : memref<8x2x32xf32, #tpu.memory_space<vmem>>, vector<1x2x32xf32>
    %287 = vector.shape_cast %286 : vector<1x2x32xf32> to vector<2x32xf32>
    %288 = arith.addf %287, %273 : vector<2x32xf32>
    %289 = arith.negf %288 : vector<2x32xf32>
    %290 = math.exp %289 : vector<2x32xf32>
    %cst_117 = arith.constant 1.000000e+00 : f32
    %291 = vector.broadcast %cst_117 : f32 to vector<2x32xf32>
    %292 = arith.addf %291, %290 : vector<2x32xf32>
    %293 = arith.divf %291, %292 : vector<2x32xf32>
    %294 = arith.index_cast %c7_i32 : i32 to index
    %c0_118 = arith.constant 0 : index
    %c0_119 = arith.constant 0 : index
    %295 = vector.load %arg3[%294, %c0_118, %c0_119] : memref<8x2x32xf32, #tpu.memory_space<vmem>>, vector<1x2x32xf32>
    %296 = vector.shape_cast %295 : vector<1x2x32xf32> to vector<2x32xf32>
    %297 = arith.mulf %284, %275 : vector<2x32xf32>
    %298 = arith.addf %296, %297 : vector<2x32xf32>
    %299 = math.tanh %298 : vector<2x32xf32>
    %cst_120 = arith.constant 1.000000e+00 : f32
    %300 = vector.broadcast %cst_120 : f32 to vector<2x32xf32>
    %301 = arith.subf %300, %293 : vector<2x32xf32>
    %302 = arith.mulf %301, %299 : vector<2x32xf32>
    %303 = arith.mulf %293, %267 : vector<2x32xf32>
    %304 = arith.addf %302, %303 : vector<2x32xf32>
    %305 = arith.index_cast %c7_i32 : i32 to index
    %c0_121 = arith.constant 0 : index
    %c0_122 = arith.constant 0 : index
    %306 = vector.load %arg6[%305, %c0_121, %c0_122] : memref<8x2x32xf32, #tpu.memory_space<vmem>>, vector<1x2x32xf32>
    %307 = vector.shape_cast %306 : vector<1x2x32xf32> to vector<2x32xf32>
    %308 = vector.shape_cast %304 : vector<2x32xf32> to vector<1x2x32xf32>
    tpu.vector_store %arg6[%305, %c0_121, %c0_122], %308 {strides = array<i32>} : memref<8x2x32xf32, #tpu.memory_space<vmem>>, vector<1x2x32xf32>,
    %c8_i32 = arith.constant 8 : i32
    %c0_123 = arith.constant 0 : index
    %c0_124 = arith.constant 0 : index
    %309 = vector.load %arg7[%c0_123, %c0_124] : memref<2x32xf32, #tpu.memory_space<vmem>>, vector<2x32xf32>
    tpu.vector_store %arg7[%c0_123, %c0_124], %304 {strides = array<i32>} : memref<2x32xf32, #tpu.memory_space<vmem>>, vector<2x32xf32>,
    return
  }
  func.func @transform_0(%arg0: i32) -> (i32, i32, i32) {
    %c0_i32 = arith.constant 0 : i32
    %c0_i32_0 = arith.constant 0 : i32
    %c0_i32_1 = arith.constant 0 : i32
    return %arg0, %c0_i32, %c0_i32_0 : i32, i32, i32
  }
  func.func @transform_1(%arg0: i32) -> (i32, i32, i32) {
    %c0_i32 = arith.constant 0 : i32
    %c0_i32_0 = arith.constant 0 : i32
    %c0_i32_1 = arith.constant 0 : i32
    return %arg0, %c0_i32, %c0_i32_0 : i32, i32, i32
  }
  func.func @transform_2(%arg0: i32) -> (i32, i32, i32) {
    %c0_i32 = arith.constant 0 : i32
    %c0_i32_0 = arith.constant 0 : i32
    %c0_i32_1 = arith.constant 0 : i32
    return %arg0, %c0_i32, %c0_i32_0 : i32, i32, i32
  }
  func.func @transform_3(%arg0: i32) -> (i32, i32, i32) {
    %c0_i32 = arith.constant 0 : i32
    %c0_i32_0 = arith.constant 0 : i32
    %c0_i32_1 = arith.constant 0 : i32
    %c0_i32_2 = arith.constant 0 : i32
    return %c0_i32, %c0_i32_0, %c0_i32_1 : i32, i32, i32
  }
  func.func @transform_4(%arg0: i32) -> (i32, i32) {
    %c0_i32 = arith.constant 0 : i32
    %c0_i32_0 = arith.constant 0 : i32
    %c0_i32_1 = arith.constant 0 : i32
    return %c0_i32, %c0_i32_0 : i32, i32
  }
  func.func @transform_5(%arg0: i32) -> (i32, i32, i32) {
    %c0_i32 = arith.constant 0 : i32
    %c0_i32_0 = arith.constant 0 : i32
    %c0_i32_1 = arith.constant 0 : i32
    return %arg0, %c0_i32, %c0_i32_0 : i32, i32, i32
  }
}

</mosaic_0001>

<bundles_post_ra>
// kernel: tpu_custom_call.1
= control target key start
LH: loop header
LB: loop body
LE: loop exit
PB: predicated region body
PF: predicated region fallthrough
CT: control target
= control target key end

     0   :  { %10 = vsyncpa [#allocation4], 0  ;;  %s1600_s0 = inlined_call_operand.hbm [shape: f32[8,2,32], index: 0, kind: input, shape index: {}]   ;;  %s1601_s1 = inlined_call_operand.hbm [shape: f32[8,2,32], index: 1, kind: input, shape index: {}]   ;;  %s1602_s2 = inlined_call_operand.hbm [shape: f32[8,2,32], index: 2, kind: input, shape index: {}]   ;;  %s1603_s3 = inlined_call_operand.hbm [shape: f32[3,32,32], index: 3, kind: input, shape index: {}]   ;;  %s1604_s4 = inlined_call_operand.vmem [shape: f32[1,32], index: 4, kind: input, shape index: {}]   ;;  %s1605_s5 = inlined_call_operand.hbm [shape: f32[8,2,32], index: 5, kind: output, shape index: {}]  }
   0x1   :  { %11 = vsyncpa [#allocation7], 0 }
   0x2   :  { %12 = vsyncpa [#allocation10], 0 }
   0x3   :  { %13 = vsyncpa [#allocation5], 0  ;;  %s31_s20 = sshll.u32 %s1601_s1, 4  ;;  %s1332_s21 = smov [#allocation6]   ;;  %s32_s20 = int_to_ptr.hbm [resolvable:$true] %s31_s20 }
   0x4   :  { %s33_s22 = sshll.u32 %s1332_s21, 4  ;;  %s18_s25 = sshll.u32 %s1600_s0, 4  ;;  %s34_s22 = int_to_ptr.vmem [resolvable:$true] %s33_s22  ;;  %s19_s25 = int_to_ptr.hbm [resolvable:$true] %s18_s25 }
   0x5   :  { %s1333_s26 = smov 32   ;;  %s1334_s27 = smov 2  }
   0x6   :  { %39 = dma.hbm_to_vmem [thread:$0]  %s32_s20, 256, %s34_s22, [#allocation7], %s1333_s26, %s1333_s26, %s1334_s27  }
   0x7   :  { %s1335_s28 = smov [#allocation3]   ;;  %s44_s1 = sshll.u32 %s1602_s2, 4  ;;  %s45_s1 = int_to_ptr.hbm [resolvable:$true] %s44_s1 }
   0x8   :  { %s20_s29 = sshll.u32 %s1335_s28, 4  ;;  %s57_s8 = sshll.u32 %s1603_s3, 4  ;;  %s21_s29 = int_to_ptr.vmem [resolvable:$true] %s20_s29  ;;  %s58_s8 = int_to_ptr.hbm [resolvable:$true] %s57_s8 }
   0x9   :  { %26 = dma.hbm_to_vmem [thread:$0]  %s19_s25, 256, %s21_s29, [#allocation4], %s1333_s26, %s1333_s26, %s1334_s27  }
   0xa   :  { %s1336_s9 = smov [#allocation8]   ;;  %s1337_s11 = smov [#allocation9]  }
   0xb   :  { %s46_s10 = sshll.u32 %s1336_s9, 4  ;;  %s59_s2 = sshll.u32 %s1337_s11, 4  ;;  %s47_s10 = int_to_ptr.vmem [resolvable:$true] %s46_s10  ;;  %s60_s2 = int_to_ptr.vmem [resolvable:$true] %s59_s2 }
   0xc   :  { %52 = dma.hbm_to_vmem [thread:$0]  %s45_s1, 256, %s47_s10, [#allocation7], %s1333_s26, %s1333_s26, %s1334_s27  }
   0xd   :  { %s1338_s12 = smov 128   ;;  %s1339_s13 = smov 8  }
   0xe   :  { %65 = dma.hbm_to_vmem [thread:$0]  %s58_s8, 1536, %s60_s2, [#allocation10], %s1338_s12, %s1338_s12, %s1339_s13  }
   0xf   :  { %1324 = dma.done.wait [#allocation4], 256  }
  0x10   :  { %1325 = vsyncadd [#allocation4], 4294967040 }
  0x11   :  { %1326 = dma.done.wait [#allocation7], 512  }
  0x12   :  { %1327 = vsyncadd [#allocation7], 4294966784 }
  0x13   :  { %1328 = dma.done.wait [#allocation10], 1536  }
  0x14   :  { %1329 = vsyncadd [#allocation10], 4294965760  ;;  %vm88_vm0 = vcmask 254976   ;;  %v1340_v0 = vmov 0.0   ;;  %v1394_v1 = vld [vmem:[#allocation9 + $0x18] sm:$0xff]  ;;  %v1398_v3 = vld [vmem:[#allocation9 + $0x10] sm:$0xff] }
  0x15   :  { %89 = vst.msk [vmem:[#allocation2] sm:$0x3] %vm88_vm0, %v1340_v0  ;;  %v1396_v2 = vld [vmem:[#allocation9 + $0x38] sm:$0xff]  ;;  %125 = vmatpush.msra.mxu0 %v1394_v1  ;;  %v1402_v4 = vld [vmem:[#allocation9 + $0x30] sm:$0xff]  ;;  %v1404_v5 = vld [vmem:[#allocation9 + $0x8] sm:$0xff]  ;;  %240 = vmatpush.msra.mxu3 %v1394_v1  ;;  %vm109_vm1 = vcmask 261120  }
  0x16   :  { %145 = vmatpush.msra.mxu1 %v1396_v2  ;;  %v1406_v6 = vld [vmem:[#allocation9 + $0x28] sm:$0xff]  ;;  %v1411_v7 = vld [vmem:[#allocation9 + $0x58] sm:$0xff]  ;;  %v1413_v8 = vld [vmem:[#allocation9 + $0x50] sm:$0xff]  ;;  %s1058_s18 = sshll.u32 %s1605_s5, 4  ;;  %s1059_s18 = int_to_ptr.hbm [resolvable:$true] %s1058_s18 }
  0x17   :  { %126 = vmatpush.msra.mxu0 %v1398_v3  ;;  %v1415_v9 = vld [vmem:[#allocation9] sm:$0xff]  ;;  %165 = vmatpush.msra.mxu2 %v1411_v7  ;;  %v1426_v12 = vld [vmem:[#allocation9 + $0x48] sm:$0xff]  ;;  %v173_v14 = vld [vmem:[#allocation3] sm:$0x3] }
  0x18   :  { %146 = vmatpush.msra.mxu1 %v1402_v4  ;;  %v1417_v10 = vld [vmem:[#allocation9 + $0x20] sm:$0xff]  ;;  %241 = vmatpush.msra.mxu3 %v1398_v3  ;;  %v1473_v30 = vld [vmem:[%s1604_s4] ss:$0 sm:$0xff]  ;;  %v215_v44 = vld [vmem:[#allocation8] sm:$0x3]  ;;  %s1341_s4 = smov [#allocation11]  }
  0x19   :  { %127 = vmatpush.msra.mxu0 %v1404_v5  ;;  %166 = vmatpush.msra.mxu2 %v1413_v8  ;;  %v1435_v13 = vld [vmem:[#allocation9 + $0x40] sm:$0xff]  ;;  %v289_v61 = vld [vmem:[#allocation3 + $0x2] sm:$0x3]  ;;  %s1056_s15 = sshll.u32 %s1341_s4, 4  ;;  %s1057_s15 = int_to_ptr.vmem [resolvable:$true] %s1056_s15 }
  0x1a   :  { %147 = vmatpush.msra.mxu1 %v1406_v6  ;;  %242 = vmatpush.msra.mxu3 %v1404_v5  ;;  %v194_v15 = vld [vmem:[#allocation6] sm:$0x3]  ;;  %v311_v57 = vld [vmem:[#allocation6 + $0x2] sm:$0x3] }
  0x1b   :  { %128 = vmatpush.msra.mxu0 %v1415_v9  ;;  %167 = vmatpush.msra.mxu2 %v1426_v12 }
  0x1c   :  { %v1423_v11 = vld [vmem:[#allocation2] sm:$0x3]  ;;  %148 = vmatpush.msra.mxu1 %v1417_v10  ;;  %243 = vmatpush.msra.mxu3 %v1415_v9 }
  0x1d   :  { %1073 = vmatmul.msk.f32.vlgmr.msra.gmra.mxu0 %vm109_vm1, %v1423_v11  ;;  %1074 = vmatmul.msk.f32.vlgmr.msra.gmra.mxu1 %vm109_vm1, %v1423_v11 }
  0x1e   :  { %260 = vmatpush.msrb.mxu0 %v1396_v2  ;;  %280 = vmatpush.msrb.mxu1 %v1411_v7 }
  0x1f   :  { %168 = vmatpush.msra.mxu2 %v1435_v13  ;;  %378 = vmatpush.msrb.mxu3 %v1396_v2 }
  0x20   :  { %261 = vmatpush.msrb.mxu0 %v1402_v4  ;;  %1075 = vmatmul.msk.f32.vlgmr.msra.gmra.mxu2 %vm109_vm1, %v1423_v11 }
  0x21   :  { %281 = vmatpush.msrb.mxu1 %v1413_v8  ;;  %358 = vmatpush.msrb.mxu2 %v1394_v1 }
  0x22   :  { %262 = vmatpush.msrb.mxu0 %v1406_v6  ;;  %379 = vmatpush.msrb.mxu3 %v1402_v4 }
  0x23   :  { %282 = vmatpush.msrb.mxu1 %v1426_v12  ;;  %359 = vmatpush.msrb.mxu2 %v1398_v3 }
  0x24   :  { %263 = vmatpush.msrb.mxu0 %v1417_v10  ;;  %380 = vmatpush.msrb.mxu3 %v1406_v6 }
  0x25   :  { %283 = vmatpush.msrb.mxu1 %v1435_v13  ;;  %360 = vmatpush.msrb.mxu2 %v1404_v5 }
  0x26   :  { %398 = vmatpush.msra.mxu0 %v1411_v7  ;;  %381 = vmatpush.msrb.mxu3 %v1417_v10 }
  0x27   :  { %476 = vmatpush.msra.mxu1 %v1394_v1  ;;  %361 = vmatpush.msrb.mxu2 %v1415_v9 }
  0x28   :  { %399 = vmatpush.msra.mxu0 %v1413_v8 }
  0x29   :  { %496 = vmatpush.msra.mxu2 %v1396_v2  ;;  %477 = vmatpush.msra.mxu1 %v1398_v3 }
  0x2a   :  { %400 = vmatpush.msra.mxu0 %v1426_v12 }
  0x2b   :  { %497 = vmatpush.msra.mxu2 %v1402_v4  ;;  %478 = vmatpush.msra.mxu1 %v1404_v5 }
  0x2c   :  { %401 = vmatpush.msra.mxu0 %v1435_v13 }
  0x2d   :  { %498 = vmatpush.msra.mxu2 %v1406_v6  ;;  %479 = vmatpush.msra.mxu1 %v1415_v9 }
  0x2f   :  { %499 = vmatpush.msra.mxu2 %v1417_v10 }
  0x9a   :  { %v130_v16 = vpop.f32.mrf.mxu0  ;;  %v150_v17 = vpop.f32.mrf.mxu1 }
  0x9b   :  { %v174_v18 = vadd.f32 %v173_v14, %v130_v16  ;;  %v195_v19 = vadd.f32 %v194_v15, %v150_v17 }
  0x9d   :  { %v1076_v20 = vmul.f32 -1.442695, %v174_v18  ;;  %v1077_v21 = vmul.f32 -1.442695, %v195_v19 }
  0x9f   :  { %1124 = vpow2.f32 %v1076_v20 }
  0xa0   :  { %1126 = vpow2.f32 %v1077_v21 }
  0xa3   :  { %v170_v33 = vpop.f32.mrf.mxu2 }
  0xa4   :  { %v171_v38 = vadd.f32 %v1473_v30, %v170_v33 }
  0xa5   :  { %v1125_v22 = vpop.eup %1124 }
  0xa6   :  { %v1127_v23 = vpop.eup %1126  ;;  %v178_v24 = vadd.f32 1.0, %v1125_v22 }
  0xa7   :  { %v199_v25 = vadd.f32 1.0, %v1127_v23 }
  0xa8   :  { %1128 = vrcp.f32 %v178_v24  ;;  %v190_v34 = vand.u32 2147483648, %v178_v24  ;;  %v188_v36 = vand.u32 2147483647, %v178_v24  ;;  %vm184_vm3 = vweird.f32 %v178_v24 }
  0xa9   :  { %1130 = vrcp.f32 %v199_v25  ;;  %vm205_vm6 = vweird.f32 %v199_v25  ;;  %v211_v45 = vand.u32 2147483648, %v199_v25  ;;  %v209_v47 = vand.u32 2147483647, %v199_v25 }
  0xaa   :  { %v191_v40 = vor.u32 1.1754944e-38, %v190_v34  ;;  %vm189_vm5 = vcmp.eq.f32.partialorder %v188_v36, 8.507059e+37 }
  0xab   :  { %v212_v50 = vor.u32 1.1754944e-38, %v211_v45  ;;  %vm210_vm9 = vcmp.eq.f32.partialorder %v209_v47, 8.507059e+37 }
  0xae   :  { %v1129_v26 = vpop.eup %1128 }
  0xaf   :  { %v1131_v27 = vpop.eup %1130  ;;  %v180_v28 = vmul.f32 %v1129_v26, %v178_v24  ;;  %vm185_vm2 = vweird.f32 %v1129_v26 }
  0xb0   :  { %v201_v29 = vmul.f32 %v1131_v27, %v199_v25  ;;  %vm186_vm4 = vmor %vm184_vm3, %vm185_vm2  ;;  %vm206_vm7 = vweird.f32 %v1131_v27 }
  0xb1   :  { %v181_v31 = vsub.f32 1.0, %v180_v28  ;;  %vm207_vm8 = vmor %vm205_vm6, %vm206_vm7 }
  0xb2   :  { %v202_v32 = vsub.f32 1.0, %v201_v29 }
  0xb3   :  { %v182_v35 = vmul.f32 %v1129_v26, %v181_v31 }
  0xb4   :  { %v203_v37 = vmul.f32 %v1131_v27, %v202_v32 }
  0xb5   :  { %v183_v39 = vadd.f32 %v1129_v26, %v182_v35  ;;  %v333_v35 = vld [vmem:[#allocation8 + $0x2] sm:$0x3] }
  0xb6   :  { %v204_v42 = vadd.f32 %v1131_v27, %v203_v37 }
  0xb7   :  { %v187_v41 = vsel %vm186_vm4, %v1129_v26, %v183_v39 }
  0xb8   :  { %v192_v43 = vsel %vm189_vm5, %v191_v40, %v187_v41  ;;  %v208_v49 = vsel %vm207_vm8, %v1131_v27, %v204_v42 }
  0xb9   :  { %v216_v46 = vmul.f32 %v192_v43, %v171_v38  ;;  %v213_v51 = vsel %vm210_vm9, %v212_v50, %v208_v49  ;;  %v429_v49 = vld [vmem:[#allocation6 + $0x4] sm:$0x3] }
  0xba   :  { %v219_v52 = vsub.f32 1.0, %v213_v51  ;;  %v221_v55 = vmul.f32 %v213_v51, %v1423_v11 }
  0xbb   :  { %v217_v48 = vadd.f32 %v216_v46, %v215_v44 }
  0xbd   :  { %1132 = vtanh.f32 %v217_v48  ;;  %v407_v48 = vld [vmem:[#allocation3 + $0x4] sm:$0x3] }
  0xc3   :  { %v1133_v53 = vpop.eup %1132 }
  0xc4   :  { %v220_v54 = vmul.f32 %v1133_v53, %v219_v52 }
  0xc6   :  { %v1477_v56 = vadd.f32 %v221_v55, %v220_v54 }
  0xc8   :  { %224 = vst.msk [vmem:[#allocation11] sm:$0x3] %vm88_vm0, %v1477_v56  ;;  %1078 = vmatmul.msk.f32.vlgmr.msra.gmra.mxu3 %vm109_vm1, %v1477_v56  ;;  %1079 = vmatmul.msk.f32.vlgmr.msrb.gmra.mxu0 %vm109_vm1, %v1477_v56 }
  0xc9   :  { %1080 = vmatmul.msk.f32.vlgmr.msrb.gmra.mxu1 %vm109_vm1, %v1477_v56  ;;  %516 = vmatpush.msra.mxu3 %v1411_v7 }
  0xca   :  { %594 = vmatpush.msrb.mxu0 %v1394_v1  ;;  %614 = vmatpush.msrb.mxu1 %v1396_v2 }
  0xcb   :  { %517 = vmatpush.msra.mxu3 %v1413_v8 }
  0xcc   :  { %595 = vmatpush.msrb.mxu0 %v1398_v3  ;;  %615 = vmatpush.msrb.mxu1 %v1402_v4 }
  0xcd   :  { %518 = vmatpush.msra.mxu3 %v1426_v12 }
  0xce   :  { %596 = vmatpush.msrb.mxu0 %v1404_v5  ;;  %616 = vmatpush.msrb.mxu1 %v1406_v6 }
  0xcf   :  { %519 = vmatpush.msra.mxu3 %v1435_v13 }
  0xd0   :  { %597 = vmatpush.msrb.mxu0 %v1415_v9  ;;  %617 = vmatpush.msrb.mxu1 %v1417_v10 }
 0x145   :  { %v265_v58 = vpop.f32.mrf.mxu0 }
 0x146   :  { %v312_v59 = vadd.f32 %v311_v57, %v265_v58  ;;  %v285_v27 = vpop.f32.mrf.mxu1 }
 0x147   :  { %v286_v31 = vadd.f32 %v1473_v30, %v285_v27 }
 0x148   :  { %v1082_v60 = vmul.f32 -1.442695, %v312_v59 }
 0x14a   :  { %1134 = vpow2.f32 %v1082_v60 }
 0x14b   :  { %v245_v62 = vpop.f32.mrf.mxu3 }
 0x14c   :  { %v290_v63 = vadd.f32 %v289_v61, %v245_v62 }
 0x14e   :  { %v1081_v0 = vmul.f32 -1.442695, %v290_v63 }
 0x150   :  { %v1135_v11 = vpop.eup %1134  ;;  %1136 = vpow2.f32 %v1081_v0 }
 0x151   :  { %v316_v14 = vadd.f32 1.0, %v1135_v11 }
 0x153   :  { %1138 = vrcp.f32 %v316_v14  ;;  %v328_v36 = vand.u32 2147483648, %v316_v14  ;;  %vm322_vm15 = vweird.f32 %v316_v14  ;;  %v326_v38 = vand.u32 2147483647, %v316_v14 }
 0x155   :  { %v329_v41 = vor.u32 1.1754944e-38, %v328_v36  ;;  %vm327_vm3 = vcmp.eq.f32.partialorder %v326_v38, 8.507059e+37 }
 0x156   :  { %v1137_v15 = vpop.eup %1136 }
 0x157   :  { %v294_v16 = vadd.f32 1.0, %v1137_v15 }
 0x159   :  { %1140 = vrcp.f32 %v294_v16  ;;  %v1139_v17 = vpop.eup %1138  ;;  %v306_v23 = vand.u32 2147483648, %v294_v16  ;;  %v304_v25 = vand.u32 2147483647, %v294_v16  ;;  %vm300_vm11 = vweird.f32 %v294_v16 }
 0x15a   :  { %v318_v18 = vmul.f32 %v1139_v17, %v316_v14  ;;  %vm323_vm14 = vweird.f32 %v1139_v17 }
 0x15b   :  { %v307_v29 = vor.u32 1.1754944e-38, %v306_v23  ;;  %vm305_vm13 = vcmp.eq.f32.partialorder %v304_v25, 8.507059e+37  ;;  %vm324_vm2 = vmor %vm322_vm15, %vm323_vm14  ;;  %v451_v25 = vld [vmem:[#allocation8 + $0x4] sm:$0x3] }
 0x15c   :  { %v319_v21 = vsub.f32 1.0, %v318_v18 }
 0x15e   :  { %v320_v26 = vmul.f32 %v1139_v17, %v319_v21 }
 0x15f   :  { %v1141_v19 = vpop.eup %1140 }
 0x160   :  { %v296_v20 = vmul.f32 %v1141_v19, %v294_v16  ;;  %vm301_vm10 = vweird.f32 %v1141_v19  ;;  %v321_v33 = vadd.f32 %v1139_v17, %v320_v26 }
 0x161   :  { %vm302_vm12 = vmor %vm300_vm11, %vm301_vm10 }
 0x162   :  { %v297_v22 = vsub.f32 1.0, %v296_v20  ;;  %v325_v40 = vsel %vm324_vm2, %v1139_v17, %v321_v33 }
 0x163   :  { %v330_v42 = vsel %vm327_vm3, %v329_v41, %v325_v40 }
 0x164   :  { %v298_v24 = vmul.f32 %v1141_v19, %v297_v22  ;;  %v337_v43 = vsub.f32 1.0, %v330_v42  ;;  %v339_v46 = vmul.f32 %v330_v42, %v1477_v56 }
 0x166   :  { %v299_v28 = vadd.f32 %v1141_v19, %v298_v24 }
 0x168   :  { %v303_v32 = vsel %vm302_vm12, %v1141_v19, %v299_v28 }
 0x169   :  { %v308_v34 = vsel %vm305_vm13, %v307_v29, %v303_v32 }
 0x16a   :  { %v334_v37 = vmul.f32 %v308_v34, %v286_v31 }
 0x16c   :  { %v335_v39 = vadd.f32 %v334_v37, %v333_v35 }
 0x16e   :  { %1142 = vtanh.f32 %v335_v39  ;;  %v525_v39 = vld [vmem:[#allocation3 + $0x6] sm:$0x3] }
 0x174   :  { %v1143_v44 = vpop.eup %1142 }
 0x175   :  { %v338_v45 = vmul.f32 %v1143_v44, %v337_v43  ;;  %v547_v43 = vld [vmem:[#allocation6 + $0x6] sm:$0x3] }
 0x177   :  { %v1501_v47 = vadd.f32 %v339_v46, %v338_v45 }
 0x179   :  { %342 = vst.msk [vmem:[#allocation11 + $0x2] sm:$0x3] %vm88_vm0, %v1501_v47  ;;  %1083 = vmatmul.msk.f32.vlgmr.msrb.gmra.mxu2 %vm109_vm1, %v1501_v47  ;;  %1084 = vmatmul.msk.f32.vlgmr.msrb.gmra.mxu3 %vm109_vm1, %v1501_v47 }
 0x17a   :  { %1085 = vmatmul.msk.f32.vlgmr.msra.gmra.mxu0 %vm109_vm1, %v1501_v47  ;;  %634 = vmatpush.msrb.mxu2 %v1411_v7 }
 0x17b   :  { %712 = vmatpush.msrb.mxu3 %v1394_v1  ;;  %732 = vmatpush.msra.mxu0 %v1396_v2 }
 0x17c   :  { %635 = vmatpush.msrb.mxu2 %v1413_v8 }
 0x17d   :  { %713 = vmatpush.msrb.mxu3 %v1398_v3  ;;  %733 = vmatpush.msra.mxu0 %v1402_v4 }
 0x17e   :  { %636 = vmatpush.msrb.mxu2 %v1426_v12 }
 0x17f   :  { %714 = vmatpush.msrb.mxu3 %v1404_v5  ;;  %734 = vmatpush.msra.mxu0 %v1406_v6 }
 0x180   :  { %637 = vmatpush.msrb.mxu2 %v1435_v13 }
 0x181   :  { %715 = vmatpush.msrb.mxu3 %v1415_v9  ;;  %735 = vmatpush.msra.mxu0 %v1417_v10 }
 0x1f7   :  { %v403_v17 = vpop.f32.mrf.mxu0 }
 0x1f8   :  { %v404_v21 = vadd.f32 %v1473_v30, %v403_v17 }
 0x1fc   :  { %v363_v50 = vpop.f32.mrf.mxu2  ;;  %v383_v51 = vpop.f32.mrf.mxu3 }
 0x1fd   :  { %v408_v52 = vadd.f32 %v407_v48, %v363_v50  ;;  %v430_v53 = vadd.f32 %v429_v49, %v383_v51 }
 0x1ff   :  { %v1086_v54 = vmul.f32 -1.442695, %v408_v52  ;;  %v1087_v55 = vmul.f32 -1.442695, %v430_v53 }
 0x201   :  { %1144 = vpow2.f32 %v1086_v54 }
 0x202   :  { %1146 = vpow2.f32 %v1087_v55 }
 0x207   :  { %v1145_v56 = vpop.eup %1144 }
 0x208   :  { %v1147_v57 = vpop.eup %1146  ;;  %v412_v58 = vadd.f32 1.0, %v1145_v56 }
 0x209   :  { %v434_v59 = vadd.f32 1.0, %v1147_v57 }
 0x20a   :  { %1148 = vrcp.f32 %v412_v58  ;;  %v424_v11 = vand.u32 2147483648, %v412_v58  ;;  %v422_v16 = vand.u32 2147483647, %v412_v58  ;;  %vm418_vm5 = vweird.f32 %v412_v58 }
 0x20b   :  { %1150 = vrcp.f32 %v434_v59  ;;  %v446_v27 = vand.u32 2147483648, %v434_v59  ;;  %vm440_vm9 = vweird.f32 %v434_v59  ;;  %v444_v28 = vand.u32 2147483647, %v434_v59 }
 0x20c   :  { %v425_v20 = vor.u32 1.1754944e-38, %v424_v11  ;;  %vm423_vm7 = vcmp.eq.f32.partialorder %v422_v16, 8.507059e+37 }
 0x20d   :  { %v447_v32 = vor.u32 1.1754944e-38, %v446_v27  ;;  %vm445_vm11 = vcmp.eq.f32.partialorder %v444_v28, 8.507059e+37 }
 0x210   :  { %v1149_v60 = vpop.eup %1148 }
 0x211   :  { %v1151_v61 = vpop.eup %1150  ;;  %v414_v62 = vmul.f32 %v1149_v60, %v412_v58  ;;  %vm419_vm4 = vweird.f32 %v1149_v60 }
 0x212   :  { %v436_v63 = vmul.f32 %v1151_v61, %v434_v59  ;;  %vm420_vm6 = vmor %vm418_vm5, %vm419_vm4  ;;  %vm441_vm8 = vweird.f32 %v1151_v61 }
 0x213   :  { %v415_v0 = vsub.f32 1.0, %v414_v62  ;;  %vm442_vm10 = vmor %vm440_vm9, %vm441_vm8 }
 0x214   :  { %v437_v14 = vsub.f32 1.0, %v436_v63 }
 0x215   :  { %v416_v15 = vmul.f32 %v1149_v60, %v415_v0 }
 0x216   :  { %v438_v18 = vmul.f32 %v1151_v61, %v437_v14  ;;  %v569_v14 = vld [vmem:[#allocation8 + $0x6] sm:$0x3] }
 0x217   :  { %v417_v19 = vadd.f32 %v1149_v60, %v416_v15 }
 0x218   :  { %v439_v24 = vadd.f32 %v1151_v61, %v438_v18 }
 0x219   :  { %v421_v22 = vsel %vm420_vm6, %v1149_v60, %v417_v19 }
 0x21a   :  { %v426_v23 = vsel %vm423_vm7, %v425_v20, %v421_v22  ;;  %v443_v31 = vsel %vm442_vm10, %v1151_v61, %v439_v24 }
 0x21b   :  { %v452_v26 = vmul.f32 %v426_v23, %v404_v21  ;;  %v448_v33 = vsel %vm445_vm11, %v447_v32, %v443_v31 }
 0x21c   :  { %v455_v34 = vsub.f32 1.0, %v448_v33  ;;  %v457_v37 = vmul.f32 %v448_v33, %v1501_v47 }
 0x21d   :  { %v453_v29 = vadd.f32 %v452_v26, %v451_v25 }
 0x21f   :  { %1152 = vtanh.f32 %v453_v29 }
 0x225   :  { %v1153_v35 = vpop.eup %1152 }
 0x226   :  { %v456_v36 = vmul.f32 %v1153_v35, %v455_v34 }
 0x228   :  { %v1525_v38 = vadd.f32 %v457_v37, %v456_v36 }
 0x22a   :  { %460 = vst.msk [vmem:[#allocation11 + $0x4] sm:$0x3] %vm88_vm0, %v1525_v38  ;;  %1088 = vmatmul.msk.f32.vlgmr.msra.gmra.mxu1 %vm109_vm1, %v1525_v38  ;;  %1089 = vmatmul.msk.f32.vlgmr.msra.gmra.mxu2 %vm109_vm1, %v1525_v38 }
 0x22b   :  { %1090 = vmatmul.msk.f32.vlgmr.msra.gmra.mxu3 %vm109_vm1, %v1525_v38  ;;  %752 = vmatpush.msra.mxu1 %v1411_v7 }
 0x22c   :  { %830 = vmatpush.msra.mxu2 %v1394_v1  ;;  %850 = vmatpush.msra.mxu3 %v1396_v2 }
 0x22d   :  { %753 = vmatpush.msra.mxu1 %v1413_v8 }
 0x22e   :  { %831 = vmatpush.msra.mxu2 %v1398_v3  ;;  %851 = vmatpush.msra.mxu3 %v1402_v4 }
 0x22f   :  { %754 = vmatpush.msra.mxu1 %v1426_v12 }
 0x230   :  { %832 = vmatpush.msra.mxu2 %v1404_v5  ;;  %852 = vmatpush.msra.mxu3 %v1406_v6 }
 0x231   :  { %755 = vmatpush.msra.mxu1 %v1435_v13 }
 0x232   :  { %833 = vmatpush.msra.mxu2 %v1415_v9  ;;  %853 = vmatpush.msra.mxu3 %v1417_v10 }
 0x2a7   :  { %v481_v40 = vpop.f32.mrf.mxu1 }
 0x2a8   :  { %v526_v41 = vadd.f32 %v525_v39, %v481_v40 }
 0x2aa   :  { %v1091_v42 = vmul.f32 -1.442695, %v526_v41 }
 0x2ac   :  { %1154 = vpow2.f32 %v1091_v42 }
 0x2ad   :  { %v501_v44 = vpop.f32.mrf.mxu2 }
 0x2ae   :  { %v548_v45 = vadd.f32 %v547_v43, %v501_v44  ;;  %v521_v58 = vpop.f32.mrf.mxu3 }
 0x2af   :  { %v522_v63 = vadd.f32 %v1473_v30, %v521_v58 }
 0x2b0   :  { %v1092_v46 = vmul.f32 -1.442695, %v548_v45 }
 0x2b2   :  { %v1155_v47 = vpop.eup %1154  ;;  %1156 = vpow2.f32 %v1092_v46 }
 0x2b3   :  { %v530_v48 = vadd.f32 1.0, %v1155_v47 }
 0x2b5   :  { %1158 = vrcp.f32 %v530_v48  ;;  %v542_v54 = vand.u32 2147483648, %v530_v48  ;;  %v540_v56 = vand.u32 2147483647, %v530_v48  ;;  %vm536_vm13 = vweird.f32 %v530_v48 }
 0x2b7   :  { %v543_v61 = vor.u32 1.1754944e-38, %v542_v54  ;;  %vm541_vm15 = vcmp.eq.f32.partialorder %v540_v56, 8.507059e+37 }
 0x2b8   :  { %v1157_v49 = vpop.eup %1156 }
 0x2b9   :  { %v552_v50 = vadd.f32 1.0, %v1157_v49 }
 0x2bb   :  { %v1159_v51 = vpop.eup %1158  ;;  %1160 = vrcp.f32 %v552_v50  ;;  %v564_v16 = vand.u32 2147483648, %v552_v50  ;;  %v562_v18 = vand.u32 2147483647, %v552_v50  ;;  %vm558_vm3 = vweird.f32 %v552_v50 }
 0x2bc   :  { %v532_v52 = vmul.f32 %v1159_v51, %v530_v48  ;;  %vm537_vm12 = vweird.f32 %v1159_v51 }
 0x2bd   :  { %vm538_vm14 = vmor %vm536_vm13, %vm537_vm12  ;;  %v565_v21 = vor.u32 1.1754944e-38, %v564_v16  ;;  %vm563_vm5 = vcmp.eq.f32.partialorder %v562_v18, 8.507059e+37  ;;  %v761_v16 = vld [vmem:[#allocation3 + $0xa] sm:$0x3] }
 0x2be   :  { %v533_v53 = vsub.f32 1.0, %v532_v52 }
 0x2c0   :  { %v534_v55 = vmul.f32 %v1159_v51, %v533_v53 }
 0x2c1   :  { %v1161_v57 = vpop.eup %1160 }
 0x2c2   :  { %v554_v59 = vmul.f32 %v1161_v57, %v552_v50  ;;  %v535_v60 = vadd.f32 %v1159_v51, %v534_v55  ;;  %vm559_vm2 = vweird.f32 %v1161_v57 }
 0x2c3   :  { %vm560_vm4 = vmor %vm558_vm3, %vm559_vm2 }
 0x2c4   :  { %v555_v62 = vsub.f32 1.0, %v554_v59  ;;  %v539_v0 = vsel %vm538_vm14, %v1159_v51, %v535_v60  ;;  %v687_v51 = vld [vmem:[#allocation8 + $0x8] sm:$0x3] }
 0x2c5   :  { %v544_v11 = vsel %vm541_vm15, %v543_v61, %v539_v0  ;;  %v783_v0 = vld [vmem:[#allocation6 + $0xa] sm:$0x3] }
 0x2c6   :  { %v556_v15 = vmul.f32 %v1161_v57, %v555_v62  ;;  %v570_v17 = vmul.f32 %v544_v11, %v522_v63 }
 0x2c8   :  { %v557_v19 = vadd.f32 %v1161_v57, %v556_v15  ;;  %v571_v20 = vadd.f32 %v570_v17, %v569_v14 }
 0x2ca   :  { %v561_v22 = vsel %vm560_vm4, %v1161_v57, %v557_v19  ;;  %1162 = vtanh.f32 %v571_v20 }
 0x2cb   :  { %v566_v23 = vsel %vm563_vm5, %v565_v21, %v561_v22 }
 0x2cc   :  { %v573_v24 = vsub.f32 1.0, %v566_v23  ;;  %v575_v27 = vmul.f32 %v566_v23, %v1525_v38 }
 0x2d0   :  { %v1163_v25 = vpop.eup %1162 }
 0x2d1   :  { %v574_v26 = vmul.f32 %v1163_v25, %v573_v24 }
 0x2d3   :  { %v1549_v28 = vadd.f32 %v575_v27, %v574_v26 }
 0x2d5   :  { %578 = vst.msk [vmem:[#allocation11 + $0x6] sm:$0x3] %vm88_vm0, %v1549_v28  ;;  %1093 = vmatmul.msk.f32.vlgmr.msrb.gmra.mxu0 %vm109_vm1, %v1549_v28  ;;  %1094 = vmatmul.msk.f32.vlgmr.msrb.gmra.mxu1 %vm109_vm1, %v1549_v28 }
 0x2d6   :  { %1095 = vmatmul.msk.f32.vlgmr.msrb.gmra.mxu2 %vm109_vm1, %v1549_v28  ;;  %870 = vmatpush.msrb.mxu0 %v1411_v7 }
 0x2d7   :  { %948 = vmatpush.msrb.mxu1 %v1394_v1  ;;  %968 = vmatpush.msrb.mxu2 %v1396_v2  ;;  %v643_v1 = vld [vmem:[#allocation3 + $0x8] sm:$0x3]  ;;  %v665_v2 = vld [vmem:[#allocation6 + $0x8] sm:$0x3] }
 0x2d8   :  { %871 = vmatpush.msrb.mxu0 %v1413_v8 }
 0x2d9   :  { %949 = vmatpush.msrb.mxu1 %v1398_v3  ;;  %969 = vmatpush.msrb.mxu2 %v1402_v4 }
 0x2da   :  { %872 = vmatpush.msrb.mxu0 %v1426_v12 }
 0x2db   :  { %950 = vmatpush.msrb.mxu1 %v1404_v5  ;;  %970 = vmatpush.msrb.mxu2 %v1406_v6 }
 0x2dc   :  { %873 = vmatpush.msrb.mxu0 %v1435_v13 }
 0x2dd   :  { %951 = vmatpush.msrb.mxu1 %v1415_v9  ;;  %971 = vmatpush.msrb.mxu2 %v1417_v10 }
 0x352   :  { %v599_v29 = vpop.f32.mrf.mxu0  ;;  %v619_v31 = vpop.f32.mrf.mxu1 }
 0x353   :  { %v644_v32 = vadd.f32 %v643_v1, %v599_v29  ;;  %v666_v3 = vadd.f32 %v665_v2, %v619_v31 }
 0x355   :  { %v1096_v33 = vmul.f32 -1.442695, %v644_v32  ;;  %v1097_v4 = vmul.f32 -1.442695, %v666_v3 }
 0x357   :  { %1164 = vpow2.f32 %v1096_v33 }
 0x358   :  { %1166 = vpow2.f32 %v1097_v4 }
 0x359   :  { %v639_v44 = vpop.f32.mrf.mxu2 }
 0x35a   :  { %v640_v47 = vadd.f32 %v1473_v30, %v639_v44  ;;  %v901_v44 = vld [vmem:[#allocation6 + $0xc] sm:$0x3] }
 0x35d   :  { %v1165_v34 = vpop.eup %1164 }
 0x35e   :  { %v1167_v5 = vpop.eup %1166  ;;  %v648_v35 = vadd.f32 1.0, %v1165_v34  ;;  %v805_v34 = vld [vmem:[#allocation8 + $0xa] sm:$0x3] }
 0x35f   :  { %v670_v6 = vadd.f32 1.0, %v1167_v5 }
 0x360   :  { %1168 = vrcp.f32 %v648_v35  ;;  %v660_v40 = vand.u32 2147483648, %v648_v35  ;;  %v658_v42 = vand.u32 2147483647, %v648_v35  ;;  %vm654_vm7 = vweird.f32 %v648_v35 }
 0x361   :  { %1170 = vrcp.f32 %v670_v6  ;;  %v682_v52 = vand.u32 2147483648, %v670_v6  ;;  %vm676_vm11 = vweird.f32 %v670_v6  ;;  %v680_v54 = vand.u32 2147483647, %v670_v6 }
 0x362   :  { %v661_v46 = vor.u32 1.1754944e-38, %v660_v40  ;;  %vm659_vm9 = vcmp.eq.f32.partialorder %v658_v42, 8.507059e+37 }
 0x363   :  { %v683_v57 = vor.u32 1.1754944e-38, %v682_v52  ;;  %vm681_vm13 = vcmp.eq.f32.partialorder %v680_v54, 8.507059e+37 }
 0x366   :  { %v1169_v36 = vpop.eup %1168 }
 0x367   :  { %v1171_v9 = vpop.eup %1170  ;;  %v650_v37 = vmul.f32 %v1169_v36, %v648_v35  ;;  %vm655_vm6 = vweird.f32 %v1169_v36 }
 0x368   :  { %v672_v10 = vmul.f32 %v1171_v9, %v670_v6  ;;  %vm656_vm8 = vmor %vm654_vm7, %vm655_vm6  ;;  %vm677_vm10 = vweird.f32 %v1171_v9 }
 0x369   :  { %v651_v38 = vsub.f32 1.0, %v650_v37  ;;  %vm678_vm12 = vmor %vm676_vm11, %vm677_vm10 }
 0x36a   :  { %v673_v39 = vsub.f32 1.0, %v672_v10 }
 0x36b   :  { %v652_v41 = vmul.f32 %v1169_v36, %v651_v38 }
 0x36c   :  { %v674_v43 = vmul.f32 %v1171_v9, %v673_v39 }
 0x36d   :  { %v653_v45 = vadd.f32 %v1169_v36, %v652_v41 }
 0x36e   :  { %v675_v49 = vadd.f32 %v1171_v9, %v674_v43  ;;  %v879_v43 = vld [vmem:[#allocation3 + $0xc] sm:$0x3] }
 0x36f   :  { %v657_v48 = vsel %vm656_vm8, %v1169_v36, %v653_v45 }
 0x370   :  { %v662_v50 = vsel %vm659_vm9, %v661_v46, %v657_v48  ;;  %v679_v56 = vsel %vm678_vm12, %v1171_v9, %v675_v49 }
 0x371   :  { %v688_v53 = vmul.f32 %v662_v50, %v640_v47  ;;  %v684_v58 = vsel %vm681_vm13, %v683_v57, %v679_v56 }
 0x372   :  { %v691_v59 = vsub.f32 1.0, %v684_v58  ;;  %v693_v62 = vmul.f32 %v684_v58, %v1549_v28 }
 0x373   :  { %v689_v55 = vadd.f32 %v688_v53, %v687_v51 }
 0x375   :  { %1172 = vtanh.f32 %v689_v55 }
 0x37b   :  { %v1173_v60 = vpop.eup %1172 }
 0x37c   :  { %v692_v61 = vmul.f32 %v1173_v60, %v691_v59 }
 0x37e   :  { %v694_v63 = vadd.f32 %v693_v62, %v692_v61 }
 0x380   :  { %696 = vst.msk [vmem:[#allocation11 + $0x8] sm:$0x3] %vm88_vm0, %v694_v63  ;;  %1098 = vmatmul.msk.f32.vlgmr.msrb.gmra.mxu3 %vm109_vm1, %v694_v63  ;;  %1099 = vmatmul.msk.f32.vlgmr.msra.gmra.mxu0 %vm109_vm1, %v694_v63 }
 0x381   :  { %1100 = vmatmul.msk.f32.vlgmr.msra.gmra.mxu1 %vm109_vm1, %v694_v63  ;;  %988 = vmatpush.msrb.mxu3 %v1411_v7 }
 0x383   :  { %989 = vmatpush.msrb.mxu3 %v1413_v8 }
 0x385   :  { %990 = vmatpush.msrb.mxu3 %v1426_v12 }
 0x387   :  { %991 = vmatpush.msrb.mxu3 %v1435_v13 }
 0x3fd   :  { %v737_v11 = vpop.f32.mrf.mxu0 }
 0x3fe   :  { %v784_v14 = vadd.f32 %v783_v0, %v737_v11  ;;  %v757_v2 = vpop.f32.mrf.mxu1 }
 0x3ff   :  { %v758_v32 = vadd.f32 %v1473_v30, %v757_v2 }
 0x400   :  { %v1102_v15 = vmul.f32 -1.442695, %v784_v14 }
 0x402   :  { %1174 = vpow2.f32 %v1102_v15 }
 0x403   :  { %v717_v17 = vpop.f32.mrf.mxu3 }
 0x404   :  { %v762_v18 = vadd.f32 %v761_v16, %v717_v17 }
 0x406   :  { %v1101_v19 = vmul.f32 -1.442695, %v762_v18 }
 0x408   :  { %v1175_v20 = vpop.eup %1174  ;;  %1176 = vpow2.f32 %v1101_v19 }
 0x409   :  { %v788_v21 = vadd.f32 1.0, %v1175_v20  ;;  %v923_v20 = vld [vmem:[#allocation8 + $0xc] sm:$0x3] }
 0x40b   :  { %1178 = vrcp.f32 %v788_v21  ;;  %v800_v5 = vand.u32 2147483648, %v788_v21  ;;  %vm794_vm5 = vweird.f32 %v788_v21  ;;  %v798_v6 = vand.u32 2147483647, %v788_v21 }
 0x40d   :  { %v801_v37 = vor.u32 1.1754944e-38, %v800_v5  ;;  %vm799_vm7 = vcmp.eq.f32.partialorder %v798_v6, 8.507059e+37 }
 0x40e   :  { %v1177_v7 = vpop.eup %1176 }
 0x40f   :  { %v766_v22 = vadd.f32 1.0, %v1177_v7 }
 0x411   :  { %1180 = vrcp.f32 %v766_v22  ;;  %v1179_v8 = vpop.eup %1178  ;;  %v778_v26 = vand.u32 2147483648, %v766_v22  ;;  %v776_v28 = vand.u32 2147483647, %v766_v22  ;;  %vm772_vm15 = vweird.f32 %v766_v22 }
 0x412   :  { %v790_v12 = vmul.f32 %v1179_v8, %v788_v21  ;;  %vm795_vm4 = vweird.f32 %v1179_v8 }
 0x413   :  { %v779_v31 = vor.u32 1.1754944e-38, %v778_v26  ;;  %vm777_vm3 = vcmp.eq.f32.partialorder %v776_v28, 8.507059e+37  ;;  %vm796_vm6 = vmor %vm794_vm5, %vm795_vm4 }
 0x414   :  { %v791_v24 = vsub.f32 1.0, %v790_v12 }
 0x416   :  { %v792_v1 = vmul.f32 %v1179_v8, %v791_v24 }
 0x417   :  { %v1181_v23 = vpop.eup %1180 }
 0x418   :  { %v768_v13 = vmul.f32 %v1181_v23, %v766_v22  ;;  %vm773_vm14 = vweird.f32 %v1181_v23  ;;  %v793_v33 = vadd.f32 %v1179_v8, %v792_v1  ;;  %v997_v1 = vld [vmem:[#allocation3 + $0xe] sm:$0x3] }
 0x419   :  { %vm774_vm2 = vmor %vm772_vm15, %vm773_vm14 }
 0x41a   :  { %v769_v25 = vsub.f32 1.0, %v768_v13  ;;  %v797_v9 = vsel %vm796_vm6, %v1179_v8, %v793_v33 }
 0x41b   :  { %v802_v10 = vsel %vm799_vm7, %v801_v37, %v797_v9 }
 0x41c   :  { %v770_v27 = vmul.f32 %v1181_v23, %v769_v25  ;;  %v809_v38 = vsub.f32 1.0, %v802_v10  ;;  %v811_v41 = vmul.f32 %v802_v10, %v694_v63 }
 0x41e   :  { %v771_v29 = vadd.f32 %v1181_v23, %v770_v27 }
 0x420   :  { %v775_v3 = vsel %vm774_vm2, %v1181_v23, %v771_v29 }
 0x421   :  { %v780_v4 = vsel %vm777_vm3, %v779_v31, %v775_v3 }
 0x422   :  { %v806_v35 = vmul.f32 %v780_v4, %v758_v32  ;;  %v1019_v32 = vld [vmem:[#allocation6 + $0xe] sm:$0x3] }
 0x424   :  { %v807_v36 = vadd.f32 %v806_v35, %v805_v34 }
 0x426   :  { %1182 = vtanh.f32 %v807_v36 }
 0x42c   :  { %v1183_v39 = vpop.eup %1182 }
 0x42d   :  { %v810_v40 = vmul.f32 %v1183_v39, %v809_v38 }
 0x42f   :  { %v812_v42 = vadd.f32 %v811_v41, %v810_v40 }
 0x431   :  { %814 = vst.msk [vmem:[#allocation11 + $0xa] sm:$0x3] %vm88_vm0, %v812_v42  ;;  %1103 = vmatmul.msk.f32.vlgmr.msra.gmra.mxu2 %vm109_vm1, %v812_v42  ;;  %1104 = vmatmul.msk.f32.vlgmr.msra.gmra.mxu3 %vm109_vm1, %v812_v42 }
 0x432   :  { %1105 = vmatmul.msk.f32.vlgmr.msrb.gmra.mxu0 %vm109_vm1, %v812_v42 }
 0x4af   :  { %v875_v0 = vpop.f32.mrf.mxu0 }
 0x4b0   :  { %v876_v16 = vadd.f32 %v1473_v30, %v875_v0 }
 0x4b4   :  { %v835_v45 = vpop.f32.mrf.mxu2  ;;  %v855_v46 = vpop.f32.mrf.mxu3 }
 0x4b5   :  { %v880_v47 = vadd.f32 %v879_v43, %v835_v45  ;;  %v902_v48 = vadd.f32 %v901_v44, %v855_v46 }
 0x4b7   :  { %v1106_v49 = vmul.f32 -1.442695, %v880_v47  ;;  %v1107_v50 = vmul.f32 -1.442695, %v902_v48 }
 0x4b9   :  { %1184 = vpow2.f32 %v1106_v49  ;;  %v1041_v49 = vld [vmem:[#allocation8 + $0xe] sm:$0x3] }
 0x4ba   :  { %1186 = vpow2.f32 %v1107_v50 }
 0x4bf   :  { %v1185_v51 = vpop.eup %1184 }
 0x4c0   :  { %v1187_v52 = vpop.eup %1186  ;;  %v884_v53 = vadd.f32 1.0, %v1185_v51 }
 0x4c1   :  { %v906_v54 = vadd.f32 1.0, %v1187_v52 }
 0x4c2   :  { %1188 = vrcp.f32 %v884_v53  ;;  %v896_v60 = vand.u32 2147483648, %v884_v53  ;;  %v894_v63 = vand.u32 2147483647, %v884_v53  ;;  %vm890_vm9 = vweird.f32 %v884_v53 }
 0x4c3   :  { %1190 = vrcp.f32 %v906_v54  ;;  %v918_v7 = vand.u32 2147483648, %v906_v54  ;;  %vm912_vm13 = vweird.f32 %v906_v54  ;;  %v916_v22 = vand.u32 2147483647, %v906_v54 }
 0x4c4   :  { %v897_v15 = vor.u32 1.1754944e-38, %v896_v60  ;;  %vm895_vm11 = vcmp.eq.f32.partialorder %v894_v63, 8.507059e+37 }
 0x4c5   :  { %v919_v23 = vor.u32 1.1754944e-38, %v918_v7  ;;  %vm917_vm15 = vcmp.eq.f32.partialorder %v916_v22, 8.507059e+37 }
 0x4c8   :  { %v1189_v55 = vpop.eup %1188 }
 0x4c9   :  { %v1191_v56 = vpop.eup %1190  ;;  %v886_v57 = vmul.f32 %v1189_v55, %v884_v53  ;;  %vm891_vm8 = vweird.f32 %v1189_v55 }
 0x4ca   :  { %v908_v58 = vmul.f32 %v1191_v56, %v906_v54  ;;  %vm892_vm10 = vmor %vm890_vm9, %vm891_vm8  ;;  %vm913_vm12 = vweird.f32 %v1191_v56 }
 0x4cb   :  { %v887_v59 = vsub.f32 1.0, %v886_v57  ;;  %vm914_vm14 = vmor %vm912_vm13, %vm913_vm12 }
 0x4cc   :  { %v909_v61 = vsub.f32 1.0, %v908_v58 }
 0x4cd   :  { %v888_v62 = vmul.f32 %v1189_v55, %v887_v59 }
 0x4ce   :  { %v910_v11 = vmul.f32 %v1191_v56, %v909_v61 }
 0x4cf   :  { %v889_v14 = vadd.f32 %v1189_v55, %v888_v62 }
 0x4d0   :  { %v911_v19 = vadd.f32 %v1191_v56, %v910_v11 }
 0x4d1   :  { %v893_v17 = vsel %vm892_vm10, %v1189_v55, %v889_v14 }
 0x4d2   :  { %v898_v18 = vsel %vm895_vm11, %v897_v15, %v893_v17  ;;  %v915_v12 = vsel %vm914_vm14, %v1191_v56, %v911_v19 }
 0x4d3   :  { %v924_v21 = vmul.f32 %v898_v18, %v876_v16  ;;  %v920_v13 = vsel %vm917_vm15, %v919_v23, %v915_v12 }
 0x4d4   :  { %v927_v24 = vsub.f32 1.0, %v920_v13  ;;  %v929_v27 = vmul.f32 %v920_v13, %v812_v42 }
 0x4d5   :  { %v925_v8 = vadd.f32 %v924_v21, %v923_v20 }
 0x4d7   :  { %1192 = vtanh.f32 %v925_v8 }
 0x4dd   :  { %v1193_v25 = vpop.eup %1192 }
 0x4de   :  { %v928_v26 = vmul.f32 %v1193_v25, %v927_v24 }
 0x4e0   :  { %v930_v28 = vadd.f32 %v929_v27, %v928_v26 }
 0x4e2   :  { %932 = vst.msk [vmem:[#allocation11 + $0xc] sm:$0x3] %vm88_vm0, %v930_v28  ;;  %1108 = vmatmul.msk.f32.vlgmr.msrb.gmra.mxu1 %vm109_vm1, %v930_v28  ;;  %1109 = vmatmul.msk.f32.vlgmr.msrb.gmra.mxu2 %vm109_vm1, %v930_v28 }
 0x4e3   :  { %1110 = vmatmul.msk.f32.vlgmr.msrb.gmra.mxu3 %vm109_vm1, %v930_v28 }
 0x55f   :  { %v953_v2 = vpop.f32.mrf.mxu1 }
 0x560   :  { %v998_v29 = vadd.f32 %v997_v1, %v953_v2 }
 0x562   :  { %v1111_v31 = vmul.f32 -1.442695, %v998_v29 }
 0x564   :  { %1194 = vpow2.f32 %v1111_v31 }
 0x565   :  { %v973_v3 = vpop.f32.mrf.mxu2 }
 0x566   :  { %v1020_v33 = vadd.f32 %v1019_v32, %v973_v3  ;;  %v993_v41 = vpop.f32.mrf.mxu3 }
 0x567   :  { %v994_v46 = vadd.f32 %v1473_v30, %v993_v41 }
 0x568   :  { %v1112_v4 = vmul.f32 -1.442695, %v1020_v33 }
 0x56a   :  { %v1195_v34 = vpop.eup %1194  ;;  %1196 = vpow2.f32 %v1112_v4 }
 0x56b   :  { %v1002_v5 = vadd.f32 1.0, %v1195_v34 }
 0x56d   :  { %1198 = vrcp.f32 %v1002_v5  ;;  %v1014_v10 = vand.u32 2147483648, %v1002_v5  ;;  %v1012_v39 = vand.u32 2147483647, %v1002_v5  ;;  %vm1008_vm2 = vweird.f32 %v1002_v5 }
 0x56f   :  { %v1015_v44 = vor.u32 1.1754944e-38, %v1014_v10  ;;  %vm1013_vm4 = vcmp.eq.f32.partialorder %v1012_v39, 8.507059e+37 }
 0x570   :  { %v1197_v35 = vpop.eup %1196 }
 0x571   :  { %v1024_v6 = vadd.f32 1.0, %v1197_v35 }
 0x573   :  { %v1199_v36 = vpop.eup %1198  ;;  %1200 = vrcp.f32 %v1024_v6  ;;  %v1036_v51 = vand.u32 2147483648, %v1024_v6  ;;  %v1034_v53 = vand.u32 2147483647, %v1024_v6  ;;  %vm1030_vm6 = vweird.f32 %v1024_v6 }
 0x574   :  { %v1004_v9 = vmul.f32 %v1199_v36, %v1002_v5  ;;  %vm1009_vm1 = vweird.f32 %v1199_v36 }
 0x575   :  { %vm1010_vm3 = vmor %vm1008_vm2, %vm1009_vm1  ;;  %v1037_v56 = vor.u32 1.1754944e-38, %v1036_v51  ;;  %vm1035_vm8 = vcmp.eq.f32.partialorder %v1034_v53, 8.507059e+37 }
 0x576   :  { %v1005_v37 = vsub.f32 1.0, %v1004_v9 }
 0x578   :  { %v1006_v38 = vmul.f32 %v1199_v36, %v1005_v37 }
 0x579   :  { %v1201_v40 = vpop.eup %1200 }
 0x57a   :  { %v1026_v42 = vmul.f32 %v1201_v40, %v1024_v6  ;;  %v1007_v43 = vadd.f32 %v1199_v36, %v1006_v38  ;;  %vm1031_vm5 = vweird.f32 %v1201_v40 }
 0x57b   :  { %vm1032_vm7 = vmor %vm1030_vm6, %vm1031_vm5 }
 0x57c   :  { %v1027_v45 = vsub.f32 1.0, %v1026_v42  ;;  %v1011_v47 = vsel %vm1010_vm3, %v1199_v36, %v1007_v43 }
 0x57d   :  { %v1016_v48 = vsel %vm1013_vm4, %v1015_v44, %v1011_v47 }
 0x57e   :  { %v1028_v50 = vmul.f32 %v1201_v40, %v1027_v45  ;;  %v1042_v52 = vmul.f32 %v1016_v48, %v994_v46 }
 0x580   :  { %v1029_v54 = vadd.f32 %v1201_v40, %v1028_v50  ;;  %v1043_v55 = vadd.f32 %v1042_v52, %v1041_v49 }
 0x582   :  { %v1033_v57 = vsel %vm1032_vm7, %v1201_v40, %v1029_v54  ;;  %1202 = vtanh.f32 %v1043_v55 }
 0x583   :  { %v1038_v58 = vsel %vm1035_vm8, %v1037_v56, %v1033_v57 }
 0x584   :  { %v1045_v59 = vsub.f32 1.0, %v1038_v58  ;;  %v1047_v61 = vmul.f32 %v1038_v58, %v930_v28 }
 0x588   :  { %v1203_v30 = vpop.eup %1202 }
 0x589   :  { %v1046_v60 = vmul.f32 %v1203_v30, %v1045_v59 }
 0x58b   :  { %v1048_v62 = vadd.f32 %v1047_v61, %v1046_v60 }
 0x58d   :  { %1050 = vst.msk [vmem:[#allocation11 + $0xe] sm:$0x3] %vm88_vm0, %v1048_v62 }
 0x58e   :  { %1051 = vst.msk [vmem:[#allocation2] sm:$0x3] %vm88_vm0, %v1048_v62  ;;  %1064 = dma.vmem_to_hbm [thread:$0]  %s1057_s15, 256, %s1059_s18, [#allocation5], %s1333_s26, %s1333_s26, %s1334_s27  }
 0x58f   :  { %1330 = dma.done.wait [#allocation5], 256  }
 0x590   :  { %1331 = vsyncadd [#allocation5], 4294967040 }
 0x591   :  { %1069 = vsyncpa [#allocation4], 1 }
 0x592   :  { %1070 = vsyncpa [#allocation7], 1 }
 0x593   :  { %1071 = vsyncpa [#allocation10], 1 }
 0x594   :  { %1072 = vsyncpa [#allocation5], 1 }

</bundles_post_ra>
